<compile_context>
chip_gen: v5e
topology: v5e:2x2
jax: 0.10.0
libtpu: 0.0.40
codegen_flags: <defaults>
</compile_context>

<pallas_src>
import functools
import numpy as np

import jax
import jax.numpy as jnp
from jax.experimental import pallas as pl
from jax.experimental.pallas import tpu as pltpu


# ----------------------------------------------------------------------------
# Network configuration (matches S3FDNet.__init__ exactly)
# ----------------------------------------------------------------------------
# ("conv", cin, cout, k, stride, pad, dilation) | ("relu",) | ("pool", ceil_mode)
VGG = [
    ("conv", 3, 64, 3, 1, 1, 1), ("relu",),
    ("conv", 64, 64, 3, 1, 1, 1), ("relu",),
    ("pool", False),
    ("conv", 64, 128, 3, 1, 1, 1), ("relu",),
    ("conv", 128, 128, 3, 1, 1, 1), ("relu",),
    ("pool", False),
    ("conv", 128, 256, 3, 1, 1, 1), ("relu",),
    ("conv", 256, 256, 3, 1, 1, 1), ("relu",),
    ("conv", 256, 256, 3, 1, 1, 1), ("relu",),
    ("pool", True),                    # ceil_mode=True
    ("conv", 256, 512, 3, 1, 1, 1), ("relu",),
    ("conv", 512, 512, 3, 1, 1, 1), ("relu",),
    ("conv", 512, 512, 3, 1, 1, 1), ("relu",),
    ("pool", False),
    ("conv", 512, 512, 3, 1, 1, 1), ("relu",),
    ("conv", 512, 512, 3, 1, 1, 1), ("relu",),
    ("conv", 512, 512, 3, 1, 1, 1), ("relu",),
    ("pool", False),
    ("conv", 512, 1024, 3, 1, 6, 6), ("relu",),   # fc6, dilation 6
    ("conv", 1024, 1024, 1, 1, 0, 1), ("relu",),  # fc7, 1x1
]

# (cin, cout, k, stride, pad); each extra conv is followed by F.relu in forward
EXTRAS = [(1024, 256, 1, 1, 0), (256, 512, 3, 2, 1),
          (512, 128, 1, 1, 0), (128, 256, 3, 2, 1)]

HEAD_IN = [256, 512, 512, 1024, 512, 256]
LOC_OUT = [4, 4, 4, 4, 4, 4]
CONF_OUT = [4, 2, 2, 2, 2, 2]

MIN_SIZES = [16, 32, 64, 128, 256, 512]
STEPS = [4, 8, 16, 32, 64, 128]
VARIANCE = (0.1, 0.2)

_LANES = 128
_VMEM_BUDGET = 36 * 1024 * 1024      # per-GEMM tile budget (safe even on v7x's 64 MiB)
_VMEM_LIMIT = 48 * 1024 * 1024


def _round_up(v, m):
    return ((v + m - 1) // m) * m


# ----------------------------------------------------------------------------
# Pallas GEMM: (M, K) @ (K, Cout) + bias, optional fused ReLU
#   bf16 MXU operands, f32 VMEM accumulator, M/N/K grid tiling.
# ----------------------------------------------------------------------------
def _mm_bias_kernel(p_ref, w_ref, b_ref, o_ref, acc_ref, *, relu):
    k = pl.program_id(2)

    @pl.when(k == 0)
    def _():
        acc_ref[...] = jnp.zeros_like(acc_ref)

    acc_ref[...] += jnp.dot(p_ref[...], w_ref[...],
                            preferred_element_type=jnp.float32)

    @pl.when(k == pl.num_programs(2) - 1)
    def _():
        out = acc_ref[...] + b_ref[...]
        if relu:
            out = jnp.maximum(out, 0.0)
        o_ref[...] = out.astype(o_ref.dtype)


def _choose_tiles(Mp, Np, Kp, out_bytes):
    """tn = full padded Cout (single pass over patches), tm up to 1024, tk up to 512.

    Keeps >=2 grid blocks on a parallel axis when possible so v7x's two
    TensorCores both get work, and guards total double-buffered VMEM usage.
    """
    # K tile: MXU-friendly, largest of {512, 256, 128} dividing Kp
    if Kp % 512 == 0:
        tk = 512
    elif Kp % 256 == 0:
        tk = 256
    else:
        tk = 128
    # N tile: whole padded Cout so the patch matrix streams from HBM exactly once
    tn = min(Np, 1024)
    while Np % tn:
        tn -= 128
    # M tile: as large as alignment allows
    if Mp % 1024 == 0 and Mp >= 2048:
        tm = 1024
    elif Mp % 512 == 0 and Mp > 512:
        tm = 512
    else:
        tm = Mp
    # megacore (v7x): if the grid collapsed to a single (i,j) block, split M in two
    if (Mp // tm) * (Np // tn) < 2:
        half = tm // 2
        if half >= 8 and half % 8 == 0 and Mp % half == 0:
            tm = half

    def est(tm_):
        return (2 * (tm_ * tk * 2 + tk * tn * 2 + tn * 4 + tm_ * tn * out_bytes)
                + tm_ * tn * 4)

    while (est(tm) > _VMEM_BUDGET and tm > 128 and tm % 16 == 0
           and Mp % (tm // 2) == 0):
        tm //= 2
    return tm, tn, tk


def matmul_bias(patches, w, b, relu, out_dtype, cout):
    """patches: (M, Kp) bf16; w: (Kp, Np) bf16 (pre-padded); b: (1, Np) f32."""
    M, Kp = patches.shape
    Np = w.shape[1]

    # M padding (K padding was already folded into the im2col concatenate)
    Mp = _round_up(M, 512) if M > 1024 else _round_up(M, 8)
    p = patches
    if Mp != M:
        p = jnp.concatenate([p, jnp.zeros((Mp - M, Kp), p.dtype)], axis=0)

    out_bytes = 4 if out_dtype == jnp.float32 else 2
    tm, tn, tk = _choose_tiles(Mp, Np, Kp, out_bytes)
    nk = Kp // tk

    # TODO(synk): on v6e, pipeline_mode=pl.Buffered(3) on the weight BlockSpec for
    # the long-K layers (fc6/fc7, 512-ch VGG) could hide the residual weight DMA.
    kernel = functools.partial(_mm_bias_kernel, relu=relu)
    out = pl.pallas_call(
        kernel,
        out_shape=jax.ShapeDtypeStruct((Mp, Np), out_dtype),
        grid=(Mp // tm, Np // tn, nk),
        in_specs=[
            pl.BlockSpec((tm, tk), lambda i, j, k: (i, k)),
            pl.BlockSpec((tk, tn), lambda i, j, k: (k, j)),
            pl.BlockSpec((1, tn), lambda i, j, k: (0, j)),
        ],
        out_specs=pl.BlockSpec((tm, tn), lambda i, j, k: (i, j)),
        scratch_shapes=[pltpu.VMEM((tm, tn), jnp.float32)],
        compiler_params=pltpu.CompilerParams(
            dimension_semantics=("parallel", "parallel", "arbitrary"),
            vmem_limit_bytes=_VMEM_LIMIT,
        ),
    )(p, w, b)
    return out[:M, :cout]


# ----------------------------------------------------------------------------
# L2Norm over channel dim (NHWC last axis), row-tiled + pipelined.
# rsqrt runs on the EUP slot (divide-free epilogue).
# ----------------------------------------------------------------------------
def _l2norm_kernel(x_ref, w_ref, o_ref):
    x = x_ref[...].astype(jnp.float32)
    ss = jnp.sum(x * x, axis=-1, keepdims=True)
    inv = jax.lax.rsqrt(ss + 1e-20)      # ~= 1 / (sqrt(ss) + 1e-10)
    o_ref[...] = (x * inv * w_ref[...]).astype(o_ref.dtype)


def l2norm(x, weight):
    N, H, W, C = x.shape
    M = N * H * W
    tm = 256                              # keep (tm, C) f32 intermediates small
    if M <= tm:
        Mp = _round_up(M, 8)
        tm = Mp
    else:
        Mp = _round_up(M, tm)
    x2 = x.reshape(M, C)
    if Mp != M:
        x2 = jnp.pad(x2, ((0, Mp - M), (0, 0)))
    out = pl.pallas_call(
        _l2norm_kernel,
        out_shape=jax.ShapeDtypeStruct((Mp, C), x.dtype),
        grid=(Mp // tm,),
        in_specs=[
            pl.BlockSpec((tm, C), lambda i: (i, 0)),
            pl.BlockSpec((1, C), lambda i: (0, 0)),
        ],
        out_specs=pl.BlockSpec((tm, C), lambda i: (i, 0)),
        compiler_params=pltpu.CompilerParams(
            dimension_semantics=("parallel",)),
    )(x2, weight.reshape(1, C))
    return out[:M].reshape(N, H, W, C)


# ----------------------------------------------------------------------------
# Fused post-processing kernel: 2-class softmax + SSD decode, lane-dense.
# Every scalar column (c0,c1, loc xywh, prior xywh) is a (rows, 128) slab so the
# stores are full-lane vst (no 2-of-128-lane masked partial stores).
# ----------------------------------------------------------------------------
def _postproc_kernel(in_ref, out_ref):
    v = in_ref[...].astype(jnp.float32)
    c0, c1 = v[0], v[1]
    lx, ly, lw, lh = v[2], v[3], v[4], v[5]
    px, py, pw, ph = v[6], v[7], v[8], v[9]

    # softmax over the 2-class axis
    m = jnp.maximum(c0, c1)
    e0 = jnp.exp(c0 - m)
    e1 = jnp.exp(c1 - m)
    inv = pl.reciprocal(e0 + e1, approx=True)   # EUP slot

    # decode(loc, priors)
    cx = px + lx * VARIANCE[0] * pw
    cy = py + ly * VARIANCE[0] * ph
    bw = pw * jnp.exp(lw * VARIANCE[1])
    bh = ph * jnp.exp(lh * VARIANCE[1])
    x1 = cx - 0.5 * bw
    y1 = cy - 0.5 * bh

    out_ref[0] = e0 * inv
    out_ref[1] = e1 * inv
    out_ref[2] = x1
    out_ref[3] = y1
    out_ref[4] = x1 + bw
    out_ref[5] = y1 + bh


def postprocess_pallas(loc4, conf2, priors4):
    """loc4/priors4: (M, 4) f32, conf2: (M, 2) f32.  Returns (softmax (M,2), boxes (M,4))."""
    M = loc4.shape[0]
    rows = -(-M // _LANES)
    rows_p = _round_up(rows, 8)
    Mp = rows_p * _LANES

    def slab(col):
        return jnp.pad(col.astype(jnp.float32), (0, Mp - M)).reshape(rows_p, _LANES)

    cols = [conf2[:, 0], conf2[:, 1],
            loc4[:, 0], loc4[:, 1], loc4[:, 2], loc4[:, 3],
            priors4[:, 0], priors4[:, 1], priors4[:, 2], priors4[:, 3]]
    inp = jnp.stack([slab(c) for c in cols], axis=0)     # (10, rows_p, 128)

    tr = min(rows_p, 512)
    while rows_p % tr:
        tr -= 8

    out = pl.pallas_call(
        _postproc_kernel,
        out_shape=jax.ShapeDtypeStruct((6, rows_p, _LANES), jnp.float32),
        grid=(rows_p // tr,),
        in_specs=[pl.BlockSpec((10, tr, _LANES), lambda i: (0, i, 0))],
        out_specs=pl.BlockSpec((6, tr, _LANES), lambda i: (0, i, 0)),
        compiler_params=pltpu.CompilerParams(
            dimension_semantics=("parallel",)),
    )(inp)

    flat = out.reshape(6, -1)[:, :M]
    conf_sm = jnp.stack([flat[0], flat[1]], axis=-1)
    boxes = jnp.stack([flat[2], flat[3], flat[4], flat[5]], axis=-1)
    return conf_sm, boxes


# ----------------------------------------------------------------------------
# Conv2d = im2col (glue) + Pallas GEMM
# ----------------------------------------------------------------------------
# TODO(synk): the 3x3 convs still materialize im2col patches in HBM (bf16);
# a tap-streaming K-grid over the 9 shifted windows would cut that traffic
# further (largest relative win on v5e), but the shifted-window blocks are not
# (8,128)-rectangular for these spatial sizes, so im2col + the big-tile GEMM
# is kept for robustness.
def _im2col(x, kh, kw, stride, padding, dilation, Kp):
    """Returns bf16 patches (M, Kp) with the K padding folded into the concat."""
    x = x.astype(jnp.bfloat16)          # bf16 patches: half the HBM traffic
    N, H, W, C = x.shape
    if padding:
        x = jnp.pad(x, ((0, 0), (padding, padding), (padding, padding), (0, 0)))
    Hp, Wp = H + 2 * padding, W + 2 * padding
    Ho = (Hp - (dilation * (kh - 1) + 1)) // stride + 1
    Wo = (Wp - (dilation * (kw - 1) + 1)) // stride + 1
    cols = []
    for i in range(kh):
        for j in range(kw):
            sl = jax.lax.slice(
                x,
                (0, i * dilation, j * dilation, 0),
                (N, i * dilation + stride * (Ho - 1) + 1,
                 j * dilation + stride * (Wo - 1) + 1, C),
                (1, stride, stride, 1),
            )
            cols.append(sl)
    K = kh * kw * C
    if Kp > K:                           # fold K padding into the single concat
        cols.append(jnp.zeros((N, Ho, Wo, Kp - K), jnp.bfloat16))
    patches = jnp.concatenate(cols, axis=-1)       # (N, Ho, Wo, Kp)
    return patches.reshape(N * Ho * Wo, Kp), (N, Ho, Wo)


def conv2d(x, cp, stride=1, padding=0, dilation=1, relu=False, out_dtype=None):
    """x: NHWC; cp: packed conv params (pre-padded bf16 weight, f32 bias)."""
    k = cp["k"]
    patches, (N, Ho, Wo) = _im2col(x, k, k, stride, padding, dilation, cp["kp"])
    if out_dtype is None:
        # intermediate (ReLU'd) activations stay bf16; head outputs stay f32
        out_dtype = jnp.bfloat16 if relu else jnp.float32
    out = matmul_bias(patches, cp["w"], cp["b"], relu, out_dtype, cp["cout"])
    return out.reshape(N, Ho, Wo, cp["cout"])


def head_convs(src, hp):
    """Fused loc+conf 3x3 head conv of one source (single im2col, single GEMM)."""
    out = conv2d(src, hp, padding=1, relu=False, out_dtype=jnp.float32)
    nl = hp["nloc"]
    return out[..., :nl], out[..., nl:]


def maxpool2x2(x, ceil_mode=False):
    # small, non-hot pooling kept as JAX glue (reshape + max)
    N, H, W, C = x.shape
    if ceil_mode:
        ph, pw = H % 2, W % 2
        if ph or pw:
            x = jnp.pad(x, ((0, 0), (0, ph), (0, pw), (0, 0)),
                        constant_values=-jnp.inf)
            H += ph
            W += pw
    else:
        H2, W2 = (H // 2) * 2, (W // 2) * 2
        x = x[:, :H2, :W2, :]
        H, W = H2, W2
    x = x.reshape(N, H // 2, 2, W // 2, 2, C)
    return jnp.max(x, axis=(2, 4))


# ----------------------------------------------------------------------------
# PriorBox + Detect/NMS post-processing (host NumPy, mirrors reference)
# ----------------------------------------------------------------------------
def priorbox_np(input_size, feature_maps, min_sizes=MIN_SIZES, steps=STEPS):
    imh, imw = input_size
    mean = []
    for k, (feath, featw) in enumerate(feature_maps):
        for i in range(feath):
            for j in range(featw):
                f_kw = imw / steps[k]
                f_kh = imh / steps[k]
                cx = (j + 0.5) / f_kw
                cy = (i + 0.5) / f_kh
                s_kw = min_sizes[k] / imw
                s_kh = min_sizes[k] / imh
                mean += [cx, cy, s_kw, s_kh]
    return np.asarray(mean, dtype=np.float32).reshape(-1, 4)


# TODO(synk): NMS has a data-dependent while-loop / dynamic-size gathers with no
# clean Pallas equivalent; it is executed on host in NumPy, mirroring the reference.
def nms_np(boxes, scores, overlap=0.5, top_k=200):
    keep = np.zeros((scores.shape[0],), dtype=np.int64)
    if boxes.size == 0:
        return keep, 0
    x1, y1, x2, y2 = boxes[:, 0], boxes[:, 1], boxes[:, 2], boxes[:, 3]
    area = (x2 - x1) * (y2 - y1)
    idx = np.argsort(scores, kind="stable")
    idx = idx[-top_k:]
    count = 0
    while idx.size > 0:
        i = idx[-1]
        keep[count] = i
        count += 1
        if idx.size == 1:
            break
        idx = idx[:-1]
        xx1 = np.maximum(x1[idx], x1[i])
        yy1 = np.maximum(y1[idx], y1[i])
        xx2 = np.minimum(x2[idx], x2[i])
        yy2 = np.minimum(y2[idx], y2[i])
        w = np.clip(xx2 - xx1, 0.0, None)
        h = np.clip(yy2 - yy1, 0.0, None)
        inter = w * h
        rem_areas = area[idx]
        union = rem_areas - inter + area[i]
        iou = inter / union
        idx = idx[iou <= overlap]
    return keep, count


def detect_np(decoded_boxes, conf_sm, num_classes=2, top_k=750,
              nms_thresh=0.3, conf_thresh=0.05, nms_top_k=5000):
    num, num_priors, _ = decoded_boxes.shape
    conf_preds = np.transpose(conf_sm, (0, 2, 1))
    output = np.zeros((num, num_classes, top_k, 5), dtype=np.float32)
    for i in range(num):
        boxes = decoded_boxes[i]
        conf_scores = conf_preds[i]
        for cl in range(1, num_classes):
            c_mask = conf_scores[cl] > conf_thresh
            scores = conf_scores[cl][c_mask]
            if scores.size == 0:
                continue
            boxes_ = boxes[c_mask].reshape(-1, 4)
            ids, count = nms_np(boxes_, scores, nms_thresh, nms_top_k)
            count = count if count < top_k else top_k
            output[i, cl, :count, 0] = scores[ids[:count]]
            output[i, cl, :count, 1:] = boxes_[ids[:count]]
    return output


# ----------------------------------------------------------------------------
# Parameter init (deterministic He-normal weights, zero biases).
# Weights are packed ONCE: reshaped to (K, Cout), cast to bf16, padded to the
# lane-dense (Kp, Np) the GEMM consumes; biases padded to (1, Np) f32.
# ----------------------------------------------------------------------------
def _pack_conv(w_hwio, b):
    kh, kw, cin, cout = w_hwio.shape
    K = kh * kw * cin
    Kp = _round_up(K, 128)
    Np = _round_up(cout, 128)
    wmat = w_hwio.reshape(K, cout).astype(jnp.bfloat16)
    wmat = jnp.pad(wmat, ((0, Kp - K), (0, Np - cout)))
    bp = jnp.pad(b.astype(jnp.float32), (0, Np - cout)).reshape(1, Np)
    return {"w": wmat, "b": bp, "k": kh, "cout": cout, "kp": Kp}


def init_params(seed=0):
    key = jax.random.PRNGKey(seed)

    def conv_init(k, ksz, cin, cout):
        std = (2.0 / (ksz * ksz * cin)) ** 0.5
        w = jax.random.normal(k, (ksz, ksz, cin, cout), jnp.float32) * std
        b = jnp.zeros((cout,), jnp.float32)
        return w, b

    params = {
        "vgg": [], "extras": [], "head": [],
        "l2norm": [jnp.full((256,), 10.0, jnp.float32),   # L2Norm3_3
                   jnp.full((512,), 8.0, jnp.float32),    # L2Norm4_3
                   jnp.full((512,), 5.0, jnp.float32)],   # L2Norm5_3
    }
    for op in VGG:
        if op[0] == "conv":
            _, cin, cout, ksz, *_ = op
            key, sub = jax.random.split(key)
            params["vgg"].append(_pack_conv(*conv_init(sub, ksz, cin, cout)))
    for (cin, cout, ksz, _, _) in EXTRAS:
        key, sub = jax.random.split(key)
        params["extras"].append(_pack_conv(*conv_init(sub, ksz, cin, cout)))
    # heads: loc+conf convs of each source fused into one packed weight
    for cin, lo, co in zip(HEAD_IN, LOC_OUT, CONF_OUT):
        key, sub = jax.random.split(key)
        lw, lb = conv_init(sub, 3, cin, lo)
        key, sub = jax.random.split(key)
        cw, cb = conv_init(sub, 3, cin, co)
        fused = _pack_conv(jnp.concatenate([lw, cw], axis=-1),
                           jnp.concatenate([lb, cb], axis=0))
        fused["nloc"] = lo
        params["head"].append(fused)
    return params


# ----------------------------------------------------------------------------
# Forward pass
# ----------------------------------------------------------------------------
def _run_vgg(x, lo, hi, vgg_params):
    ci = sum(1 for op in VGG[:lo] if op[0] == "conv")
    for k in range(lo, hi):
        op = VGG[k]
        if op[0] == "conv":
            _, _, _, _, st, pad, dil = op
            cp = vgg_params[ci]
            ci += 1
            # the ReLU that always follows each VGG conv is fused into the GEMM
            x = conv2d(x, cp, stride=st, padding=pad, dilation=dil, relu=True)
        elif op[0] == "relu":
            pass  # fused above
        else:
            x = maxpool2x2(x, ceil_mode=op[1])
    return x


def s3fd_forward(x_nchw, params):
    # layout: input is NCHW (PyTorch convention); converted once to NHWC here.
    x = jnp.transpose(x_nchw, (0, 2, 3, 1)).astype(jnp.float32)
    num = x.shape[0]
    in_size = (x.shape[1], x.shape[2])

    sources = []
    x = _run_vgg(x, 0, 16, params["vgg"])
    sources.append(l2norm(x, params["l2norm"][0]))
    x = _run_vgg(x, 16, 23, params["vgg"])
    sources.append(l2norm(x, params["l2norm"][1]))
    x = _run_vgg(x, 23, 30, params["vgg"])
    sources.append(l2norm(x, params["l2norm"][2]))
    x = _run_vgg(x, 30, len(VGG), params["vgg"])
    sources.append(x)

    for k, (cp, (_, _, _, st, pad)) in enumerate(zip(params["extras"], EXTRAS)):
        x = conv2d(x, cp, stride=st, padding=pad, relu=True)
        if k % 2 == 1:
            sources.append(x)

    # heads: one fused (loc+conf) GEMM per source, sharing a single im2col
    loc_list, conf_list = [], []
    loc_x, conf_x = head_convs(sources[0], params["head"][0])
    max_conf = jnp.max(conf_x[..., 0:3], axis=-1, keepdims=True)
    conf_x = jnp.concatenate([max_conf, conf_x[..., 3:4]], axis=-1)
    loc_list.append(loc_x)    # already NHWC == permute(0,2,3,1)
    conf_list.append(conf_x)
    for i in range(1, len(sources)):
        loc_x, conf_x = head_convs(sources[i], params["head"][i])
        loc_list.append(loc_x)
        conf_list.append(conf_x)

    features_maps = [[o.shape[1], o.shape[2]] for o in loc_list]
    loc = jnp.concatenate([o.reshape(num, -1) for o in loc_list], axis=1)
    conf = jnp.concatenate([o.reshape(num, -1) for o in conf_list], axis=1)

    priors = priorbox_np(in_size, features_maps)           # (num_priors, 4), host
    num_priors = priors.shape[0]
    batch_priors = jnp.broadcast_to(jnp.asarray(priors)[None],
                                    (num, num_priors, 4)).reshape(-1, 4)

    # fused lane-dense softmax + decode
    conf_sm, decoded = postprocess_pallas(loc.reshape(-1, 4),
                                          conf.reshape(-1, 2),
                                          batch_priors)
    conf_sm = conf_sm.reshape(num, num_priors, 2)
    decoded = decoded.reshape(num, num_priors, 4)

    jax.block_until_ready((decoded, conf_sm))
    output = detect_np(np.asarray(decoded), np.asarray(conf_sm))
    return output, decoded, conf_sm


# ----------------------------------------------------------------------------
if __name__ == "__main__":
    params = init_params(0)
    x = jax.random.normal(jax.random.PRNGKey(0), (2, 3, 64, 64), jnp.float32)
    output, decoded, conf_sm = s3fd_forward(x, params)
    jax.block_until_ready((decoded, conf_sm))
    assert output.shape == (2, 2, 750, 5)
    assert np.all(np.isfinite(output))
    print("KERNEL_OK")
</pallas_src>

<mosaic_0001>
module attributes {stable_mosaic.version = 11 : i64} {
  func.func @_mm_bias_kernel(%arg0: i32, %arg1: i32, %arg2: i32, %arg3: memref<1024x128xbf16, #tpu.memory_space<vmem>>, %arg4: memref<128x128xbf16, #tpu.memory_space<vmem>>, %arg5: memref<1x128xf32, #tpu.memory_space<vmem>>, %arg6: memref<1024x128xbf16, #tpu.memory_space<vmem>>, %arg7: memref<1024x128xf32, #tpu.memory_space<vmem>>) attributes {dimension_semantics = [#tpu.dimension_semantics<parallel>, #tpu.dimension_semantics<parallel>, #tpu.dimension_semantics<arbitrary>], iteration_bounds = array<i64: 8, 1, 1>, scalar_prefetch = 0 : i64, scratch_operands = 1 : i64, tpu.core_type = #tpu.core_type<tc>, window_params = [{transform_indices = @transform_0, window_bounds = array<i64: 1024, 128>}, {transform_indices = @transform_1, window_bounds = array<i64: 128, 128>}, {transform_indices = @transform_2, window_bounds = array<i64: 1, 128>}, {transform_indices = @transform_3, window_bounds = array<i64: 1024, 128>}]} {
    %c0_i32 = arith.constant 0 : i32
    %0 = arith.cmpi eq, %arg2, %c0_i32 : i32
    %1 = arith.extui %0 : i1 to i32
    %c0_i32_0 = arith.constant 0 : i32
    %2 = arith.cmpi ne, %1, %c0_i32_0 : i32
    scf.if %2 {
      %cst_10 = arith.constant 0.000000e+00 : f32
      %12 = vector.broadcast %cst_10 : f32 to vector<1024x128xf32>
      %c0_11 = arith.constant 0 : index
      %c0_12 = arith.constant 0 : index
      %13 = vector.load %arg7[%c0_11, %c0_12] : memref<1024x128xf32, #tpu.memory_space<vmem>>, vector<1024x128xf32>
      tpu.vector_store %arg7[%c0_11, %c0_12], %12 {strides = array<i32>} : memref<1024x128xf32, #tpu.memory_space<vmem>>, vector<1024x128xf32>,
    } else {
    }
    %c0 = arith.constant 0 : index
    %c0_1 = arith.constant 0 : index
    %3 = vector.load %arg7[%c0, %c0_1] : memref<1024x128xf32, #tpu.memory_space<vmem>>, vector<1024x128xf32>
    %c0_2 = arith.constant 0 : index
    %c0_3 = arith.constant 0 : index
    %4 = vector.load %arg3[%c0_2, %c0_3] : memref<1024x128xbf16, #tpu.memory_space<vmem>>, vector<1024x128xbf16>
    %c0_4 = arith.constant 0 : index
    %c0_5 = arith.constant 0 : index
    %5 = vector.load %arg4[%c0_4, %c0_5] : memref<128x128xbf16, #tpu.memory_space<vmem>>, vector<128x128xbf16>
    %cst = arith.constant dense<0.000000e+00> : vector<1024x128xf32>
    %6 = tpu.matmul %4, %5, %cst {dimension_numbers = #tpu.dot_dimension_numbers<[1], [0], [0], [1], [0, 0, 1, 1], [], []>} : vector<1024x128xbf16>, vector<128x128xbf16>, vector<1024x128xf32> -> vector<1024x128xf32>
    %7 = arith.addf %3, %6 : vector<1024x128xf32>
    %c0_6 = arith.constant 0 : index
    %c0_7 = arith.constant 0 : index
    %8 = vector.load %arg7[%c0_6, %c0_7] : memref<1024x128xf32, #tpu.memory_space<vmem>>, vector<1024x128xf32>
    tpu.vector_store %arg7[%c0_6, %c0_7], %7 {strides = array<i32>} : memref<1024x128xf32, #tpu.memory_space<vmem>>, vector<1024x128xf32>,
    %c0_i32_8 = arith.constant 0 : i32
    %9 = arith.cmpi eq, %arg2, %c0_i32_8 : i32
    %10 = arith.extui %9 : i1 to i32
    %c0_i32_9 = arith.constant 0 : i32
    %11 = arith.cmpi ne, %10, %c0_i32_9 : i32
    scf.if %11 {
      %c0_10 = arith.constant 0 : index
      %c0_11 = arith.constant 0 : index
      %12 = vector.load %arg7[%c0_10, %c0_11] : memref<1024x128xf32, #tpu.memory_space<vmem>>, vector<1024x128xf32>
      %c0_12 = arith.constant 0 : index
      %c0_13 = arith.constant 0 : index
      %13 = vector.load %arg5[%c0_12, %c0_13] : memref<1x128xf32, #tpu.memory_space<vmem>>, vector<1x128xf32>
      %14 = vector.broadcast %13 : vector<1x128xf32> to vector<1024x128xf32>
      %15 = arith.addf %12, %14 : vector<1024x128xf32>
      %cst_14 = arith.constant 0.000000e+00 : f32
      %16 = vector.broadcast %cst_14 : f32 to vector<1024x128xf32>
      %17 = arith.maximumf %15, %16 : vector<1024x128xf32>
      %18 = arith.truncf %17 : vector<1024x128xf32> to vector<1024x128xbf16>
      %c0_15 = arith.constant 0 : index
      %c0_16 = arith.constant 0 : index
      %19 = vector.load %arg6[%c0_15, %c0_16] : memref<1024x128xbf16, #tpu.memory_space<vmem>>, vector<1024x128xbf16>
      tpu.vector_store %arg6[%c0_15, %c0_16], %18 {strides = array<i32>} : memref<1024x128xbf16, #tpu.memory_space<vmem>>, vector<1024x128xbf16>,
    } else {
    }
    return
  }
  func.func @transform_0(%arg0: i32, %arg1: i32, %arg2: i32) -> (i32, i32) {
    %c0_i32 = arith.constant 0 : i32
    return %arg0, %arg2 : i32, i32
  }
  func.func @transform_1(%arg0: i32, %arg1: i32, %arg2: i32) -> (i32, i32) {
    %c0_i32 = arith.constant 0 : i32
    return %arg2, %arg1 : i32, i32
  }
  func.func @transform_2(%arg0: i32, %arg1: i32, %arg2: i32) -> (i32, i32) {
    %c0_i32 = arith.constant 0 : i32
    %c0_i32_0 = arith.constant 0 : i32
    return %c0_i32, %arg1 : i32, i32
  }
  func.func @transform_3(%arg0: i32, %arg1: i32, %arg2: i32) -> (i32, i32) {
    %c0_i32 = arith.constant 0 : i32
    return %arg0, %arg1 : i32, i32
  }
}

</mosaic_0001>

<bundles_post_ra>
// kernel: tpu_custom_call.1
= control target key start
LH: loop header
LB: loop body
LE: loop exit
PB: predicated region body
PF: predicated region fallthrough
CT: control target
= control target key end

     0   :  { %8 = vsyncpa [#allocation4], 0  ;;  %s3943_s0 = inlined_call_operand.hbm [shape: bf16[8192,128], index: 0, kind: input, shape index: {}]   ;;  %s3944_s1 = inlined_call_operand.hbm [shape: bf16[128,128], index: 1, kind: input, shape index: {}]   ;;  %s3945_s2 = inlined_call_operand.hbm [shape: f32[1,128], index: 2, kind: input, shape index: {}]   ;;  %s3946_s3 = inlined_call_operand.hbm [shape: bf16[8192,128], index: 3, kind: output, shape index: {}]  }
   0x1   :  { %10 = vsyncpa [#allocation4 + $0x1], 0 }
   0x2   :  { %11 = vsyncpa [#allocation7], 0 }
   0x3   :  { %12 = vsyncpa [#allocation5], 0 }
   0x4   :  { %14 = vsyncpa [#allocation5 + $0x1], 0  ;;  %s3544_s12 = smov 0   ;;  %s3546_s13 = smov 0  }
   0x5   :  { %s3548_s14 = smov 0   ;;  %s3550_s15 = smov 0  }
   0x6   :  { %s3552_s16 = smov 0   ;;  %s3554_s17 = smov 0  }
   0x7 LB: > { %s2463_s18 = sadd.s32 4294967295, %s3516_s17   ;;  %s2464_s19 = sadd.s32 4294967294, %s3516_s17   ;;  %s3516_s17 = sphi %s3554_s17, %s20_s17   ;;  %s3512_s16 = sphi %s3552_s16, %s3956_s16   ;;  %s3508_s15 = sphi %s3550_s15, %s3955_s15   ;;  %s3504_s14 = sphi %s3548_s14, %s3954_s14   ;;  %s3500_s13 = sphi %s3546_s13, %s3953_s13   ;;  %s3496_s12 = sphi %s3544_s12, %s3952_s12  }
   0x8   : > { %p61_p0 = scmp.ne.s32.totalorder %s3500_s13, %s3496_s12  ;;  %p3578_p1 = scmp.eq.s32.totalorder %s2463_s18, 0 }
   0x9   : > { %p147_p2 = scmp.eq.s32.totalorder %s2464_s19, 7  ;;  %p2465_p4 = scmp.ge.s32.totalorder %s3516_s17, 1 }
   0xa   : > { %p3584_p3 = por %p3578_p1, %p61_p0  ;;  %p154_p6 = scmp.lt.s32.totalorder %s3516_s17, 9 }
   0xb   : > { %p3589_p5 = por %p147_p2, %p61_p0  ;;  %s169_s25 = sshll.u32 %s3944_s1, 4  ;;  %s170_s25 = int_to_ptr.hbm [resolvable:$true] %s169_s25 }
   0xc   : > { %p3597_p7 = pnand %p2465_p4, %p154_p6  ;;  %s3518_s27 = smov [#allocation6]  }
   0xd   : > { %s171_s28 = sshll.u32 %s3518_s27, 4  ;;  %s185_s4 = sshll.u32 %s3945_s2, 4  ;;  %s172_s28 = int_to_ptr.vmem [resolvable:$true] %s171_s28  ;;  %s186_s4 = int_to_ptr.hbm [resolvable:$true] %s185_s4 }
   0xe   : > { %p3263_p8 = pneg %p3597_p7  ;;  %s3519_s5 = smov 64  }
   0xf   : > { %s3520_s6 = smov 4   ;;  %s3521_s7 = smov [#allocation8]  }
  0x10   : > { %p3264_p9 = pnand %p3263_p8, %p3578_p1  ;;  %s187_s8 = sshll.u32 %s3521_s7, 4  ;;  %s188_s8 = int_to_ptr.vmem [resolvable:$true] %s187_s8 }
  0x11   : > { %p141_p10 = scmp.eq.s32.totalorder %s2463_s18, 7  ;;  %s39_s9 = sadd.s32 1, %s3512_s16 }
  0x12   : > { %3266 = dma.hbm_to_vmem [thread:$0]  (!%p3264_p9), %s170_s25, 1024, %s172_s28, [#allocation7], %s3519_s5, %s3519_s5, %s3520_s6  }
  0x13   : > { %3269 = dma.hbm_to_vmem [thread:$0]  (!%p3264_p9), %s186_s4, 16, %s188_s8, [#allocation7]  }
  0x14   : > { %p41_p11 = scmp.ge.s32.totalorder %s39_s9, 8  ;;  %s48_s10 = sadd.s32 1, %s3504_s14 }
  0x15   : > { %p55_p12 = scmp.ne.s32.totalorder %s3504_s14, %s3500_s13  ;;  %p56_p13 = scmp.eq.s32.totalorder %s3516_s17, 0 }
  0x16   : > { %s3958_s9 = smov (%p41_p11, %s39_s9), 0  ;;  %p3280_p2 = scmp.lt.s32.totalorder %s3516_s17, 8 }
  0x17   : > { %p3618_p0 = por %p141_p10, %p55_p12  ;;  %s43_s19 = ssub.s32 %s3512_s16, %s3958_s9 }
  0x18   : > { %s198_s23 = sand.u32 1, %s3504_s14   ;;  %p46_p4 = scmp.eq.s32.totalorder %s43_s19, 0 }
  0x19   : > { %p57_p6 = por %p56_p13, %p55_p12  ;;  %s2469_s24 = sshll.u32 %s198_s23, 9 }
  0x1a   : > { %s2770_s18 = sshll.u32 %s3512_s16, 9  ;;  %s202_s4 = scalar_lea.vmem [#allocation3], %s2469_s24 }
  0x1b   : > { %s3628_s25 = scalar_select %p46_p4, %s3504_s14, %s48_s10  }
  0x1c   : > { %s208_s29 = scalar_lea.hbm %s3943_s0, %s2770_s18  ;;  %s211_s7 = sshll.u32 %s202_s4, 4  ;;  %s212_s7 = int_to_ptr.vmem [resolvable:$true] %s211_s7 }
  0x1d   : > { %s209_s30 = sshll.u32 %s208_s29, 4  ;;  %p3271_p8 = pnand %p3280_p2, %p57_p6  ;;  %s210_s30 = int_to_ptr.hbm [resolvable:$true] %s209_s30 }
  0x1e   : > { %s199_s8 = scalar_lea.sflag [#allocation4], %s198_s23  ;;  %223 = sbr.rel (%p3597_p7) target bundleno = 462 (0x1ce), region = 32 }
  0x1f   : > { %3273 = dma.hbm_to_vmem [thread:$0]  (!%p3271_p8), %s210_s30, 8192, %s212_s7, %s199_s8, %s3519_s5, %s3519_s5, %s3520_s6  }
  0x20   : > { %s3641_s10 = sand.u32 (!%p3597_p7), 1, %s3500_s13  }
  0x21   : > { %s2473_s19 = sshll.u32 (!%p3597_p7), %s3641_s10, 9  ;;  %s226_s24 = scalar_lea.sflag (!%p3597_p7), [#allocation4], %s3641_s10 }
  0x22   : > { %s3647_s18 = scalar_lea.vmem (!%p3597_p7), [#allocation3], %s2473_s19 }
  0x23   : > { %3483 = dma.done.wait (%p3584_p3), %s226_s24, 8192  }
  0x24   : > { %3485 = vsyncadd (%p3584_p3), %s226_s24, 4294959104 }
  0x25   : > { %3487 = dma.done.wait (%p3578_p1), [#allocation7], 1040  }
  0x26   : > { %3489 = vsyncadd (%p3578_p1), [#allocation7], 4294966256  ;;  %v2842_v0 = vld [vmem:[#allocation6 + $0x38] sm:$0xff]  ;;  %v2841_v1 = vld [vmem:[#allocation6 + $0x30] sm:$0xff]  ;;  %s3703_s20 = scalar_lea.vmem [#allocation9], %s2473_s19  ;;  %s2843_s21 = sshll.u32 %s3508_s15, 9 }
  0x27   : > { %1102 = vmatpush.bf16.msra.mxu0 %v2842_v0  ;;  %3227 = vmatpush.bf16.msra.mxu1 %v2842_v0  ;;  %v2840_v2 = vld [vmem:[#allocation6 + $0x28] sm:$0xff]  ;;  %v2839_v3 = vld [vmem:[#allocation6 + $0x20] sm:$0xff]  ;;  %v2838_v4 = vld [vmem:[#allocation6 + $0x18] sm:$0xff]  ;;  %s2347_s6 = scalar_lea.hbm %s3946_s3, %s2843_s21  ;;  %s2348_s23 = sshll.u32 %s3703_s20, 4  ;;  %s2349_s23 = int_to_ptr.vmem [resolvable:$true] %s2348_s23 }
  0x28   : > { %3228 = vmatpush.bf16.msra.mxu2 %v2842_v0  ;;  %3229 = vmatpush.bf16.msra.mxu3 %v2842_v0  ;;  %v2837_v5 = vld [vmem:[#allocation6 + $0x10] sm:$0xff]  ;;  %v2836_v6 = vld [vmem:[#allocation6 + $0x8] sm:$0xff]  ;;  %v2835_v7 = vld [vmem:[#allocation6] sm:$0xff]  ;;  %s2350_s27 = sshll.u32 %s2347_s6, 4  ;;  %s2335_s15 = scalar_lea.sflag [#allocation5], %s3641_s10  ;;  %s2351_s27 = int_to_ptr.hbm [resolvable:$true] %s2350_s27 }
  0x29   : > { %v2771_v8 = vld [vmem:[%s3647_s18] sm:$0xff]  ;;  %v2772_v12 = vld [vmem:[%s3647_s18 + $0x8] sm:$0xff]  ;;  %v2773_v16 = vld [vmem:[%s3647_s18 + $0x10] sm:$0xff]  ;;  %s3444_s28 = sshra.s32 %s2351_s27, 4  ;;  %s3450_s7 = scalar_lea.hbm %s3946_s3, 4096  ;;  %s3445_s28 = int_to_ptr.hbm [resolvable:$true] %s3444_s28 }
  0x2a   : > { %v2787_v9 = vld [vmem:[%s3647_s18 + $0x80] sm:$0xff]  ;;  %v2788_v13 = vld [vmem:[%s3647_s18 + $0x88] sm:$0xff]  ;;  %v2789_v17 = vld [vmem:[%s3647_s18 + $0x90] sm:$0xff]  ;;  %s3446_s29 = scalar_lea.hbm %s3445_s28, 512  ;;  %p3451_p9 = scmp.lt.s32.totalorder %s3445_s28, %s3946_s3 }
  0x2b   : > { %1103 = vmatpush.bf16.msra.mxu0 %v2841_v1  ;;  %3230 = vmatpush.bf16.msra.mxu1 %v2841_v1  ;;  %v2803_v10 = vld [vmem:[%s3647_s18 + $0x100] sm:$0xff]  ;;  %v2804_v14 = vld [vmem:[%s3647_s18 + $0x108] sm:$0xff]  ;;  %v2805_v18 = vld [vmem:[%s3647_s18 + $0x110] sm:$0xff]  ;;  %p3447_p1 = scmp.ne.s32.totalorder %s3445_s28, %s3446_s29  ;;  %p3452_p10 = scmp.lt.s32.totalorder %s3450_s7, %s3446_s29 }
  0x2c   : > { %3231 = vmatpush.bf16.msra.mxu2 %v2841_v1  ;;  %3232 = vmatpush.bf16.msra.mxu3 %v2841_v1  ;;  %v2819_v11 = vld [vmem:[%s3647_s18 + $0x180] sm:$0xff]  ;;  %v2820_v15 = vld [vmem:[%s3647_s18 + $0x188] sm:$0xff]  ;;  %v2821_v19 = vld [vmem:[%s3647_s18 + $0x190] sm:$0xff] }
  0x2d   : > { %v2774_v20 = vld [vmem:[%s3647_s18 + $0x18] sm:$0xff]  ;;  %v2775_v24 = vld [vmem:[%s3647_s18 + $0x20] sm:$0xff]  ;;  %v2776_v28 = vld [vmem:[%s3647_s18 + $0x28] sm:$0xff]  ;;  %p3448_p3 = pnand %p3447_p1, %p3618_p0  ;;  %p3453_p11 = por %p3452_p10, %p3451_p9 }
  0x2e   : > { %v2790_v21 = vld [vmem:[%s3647_s18 + $0x98] sm:$0xff]  ;;  %v2791_v25 = vld [vmem:[%s3647_s18 + $0xa0] sm:$0xff]  ;;  %v2792_v29 = vld [vmem:[%s3647_s18 + $0xa8] sm:$0xff] }
  0x2f   : > { %1104 = vmatpush.bf16.msra.mxu0 %v2840_v2  ;;  %3233 = vmatpush.bf16.msra.mxu1 %v2840_v2  ;;  %v2806_v22 = vld [vmem:[%s3647_s18 + $0x118] sm:$0xff]  ;;  %v2807_v26 = vld [vmem:[%s3647_s18 + $0x120] sm:$0xff]  ;;  %v2808_v30 = vld [vmem:[%s3647_s18 + $0x128] sm:$0xff]  ;;  %p3449_p7 = pneg %p3448_p3 }
  0x30   : > { %3234 = vmatpush.bf16.msra.mxu2 %v2840_v2  ;;  %3235 = vmatpush.bf16.msra.mxu3 %v2840_v2  ;;  %v2822_v23 = vld [vmem:[%s3647_s18 + $0x198] sm:$0xff]  ;;  %v2823_v27 = vld [vmem:[%s3647_s18 + $0x1a0] sm:$0xff]  ;;  %v2824_v31 = vld [vmem:[%s3647_s18 + $0x1a8] sm:$0xff] }
  0x31   : > { %v2777_v32 = vld [vmem:[%s3647_s18 + $0x30] sm:$0xff]  ;;  %v2778_v36 = vld [vmem:[%s3647_s18 + $0x38] sm:$0xff]  ;;  %v2779_v40 = vld [vmem:[%s3647_s18 + $0x40] sm:$0xff]  ;;  %p3454_p12 = pnand %p3453_p11, %p3449_p7 }
  0x32   : > { %v2793_v33 = vld [vmem:[%s3647_s18 + $0xb0] sm:$0xff]  ;;  %v2794_v37 = vld [vmem:[%s3647_s18 + $0xb8] sm:$0xff]  ;;  %v2795_v41 = vld [vmem:[%s3647_s18 + $0xc0] sm:$0xff] }
  0x33   : > { %1105 = vmatpush.bf16.msra.mxu0 %v2839_v3  ;;  %3236 = vmatpush.bf16.msra.mxu1 %v2839_v3  ;;  %v2809_v34 = vld [vmem:[%s3647_s18 + $0x130] sm:$0xff]  ;;  %v2810_v38 = vld [vmem:[%s3647_s18 + $0x138] sm:$0xff]  ;;  %v2811_v44 = vld [vmem:[%s3647_s18 + $0x140] sm:$0xff] }
  0x34   : > { %3237 = vmatpush.bf16.msra.mxu2 %v2839_v3  ;;  %3238 = vmatpush.bf16.msra.mxu3 %v2839_v3  ;;  %v2825_v35 = vld [vmem:[%s3647_s18 + $0x1b0] sm:$0xff]  ;;  %v2826_v39 = vld [vmem:[%s3647_s18 + $0x1b8] sm:$0xff]  ;;  %v2827_v45 = vld [vmem:[%s3647_s18 + $0x1c0] sm:$0xff] }
  0x35   : > { %v3693_v46 = vld [vmem:[#allocation8] ss:$0 sm:$0xff]  ;;  %v2780_v1 = vld [vmem:[%s3647_s18 + $0x48] sm:$0xff] }
  0x36   : > { %v2796_v2 = vld [vmem:[%s3647_s18 + $0xc8] sm:$0xff] }
  0x37   : > { %1106 = vmatpush.bf16.msra.mxu0 %v2838_v4  ;;  %3239 = vmatpush.bf16.msra.mxu1 %v2838_v4 }
  0x38   : > { %3240 = vmatpush.bf16.msra.mxu2 %v2838_v4  ;;  %3241 = vmatpush.bf16.msra.mxu3 %v2838_v4 }
  0x3b   : > { %1107 = vmatpush.bf16.msra.mxu0 %v2837_v5  ;;  %3242 = vmatpush.bf16.msra.mxu1 %v2837_v5 }
  0x3c   : > { %3243 = vmatpush.bf16.msra.mxu2 %v2837_v5  ;;  %3244 = vmatpush.bf16.msra.mxu3 %v2837_v5 }
  0x3f   : > { %1108 = vmatpush.bf16.msra.mxu0 %v2836_v6  ;;  %3245 = vmatpush.bf16.msra.mxu1 %v2836_v6 }
  0x40   : > { %3246 = vmatpush.bf16.msra.mxu2 %v2836_v6  ;;  %3247 = vmatpush.bf16.msra.mxu3 %v2836_v6 }
  0x43   : > { %1109 = vmatpush.bf16.msra.mxu0 %v2835_v7  ;;  %3248 = vmatpush.bf16.msra.mxu1 %v2835_v7 }
  0x44   : > { %3249 = vmatpush.bf16.msra.mxu2 %v2835_v7  ;;  %3250 = vmatpush.bf16.msra.mxu3 %v2835_v7  ;;  %v2812_v7 = vld [vmem:[%s3647_s18 + $0x148] sm:$0xff] }
  0x46   : > { %1110 = vmatmul.bf16.vlgmr.msra.gmra.mxu0 %v2771_v8  ;;  %1190 = vmatmul.bf16.vlgmr.msra.gmra.mxu1 %v2787_v9  ;;  %v2828_v8 = vld [vmem:[%s3647_s18 + $0x1c8] sm:$0xff] }
  0x47   : > { %1270 = vmatmul.bf16.vlgmr.msra.gmra.mxu2 %v2803_v10  ;;  %1350 = vmatmul.bf16.vlgmr.msra.gmra.mxu3 %v2819_v11 }
  0x56   : > { %1115 = vmatmul.bf16.gmra.mxu0 %v2772_v12  ;;  %1195 = vmatmul.bf16.gmra.mxu1 %v2788_v13 }
  0x57   : > { %1275 = vmatmul.bf16.gmra.mxu2 %v2804_v14  ;;  %1355 = vmatmul.bf16.gmra.mxu3 %v2820_v15 }
  0x66   : > { %1120 = vmatmul.bf16.gmra.mxu0 %v2773_v16  ;;  %1200 = vmatmul.bf16.gmra.mxu1 %v2789_v17 }
  0x67   : > { %1280 = vmatmul.bf16.gmra.mxu2 %v2805_v18  ;;  %1360 = vmatmul.bf16.gmra.mxu3 %v2821_v19 }
  0x76   : > { %1125 = vmatmul.bf16.gmra.mxu0 %v2774_v20  ;;  %1205 = vmatmul.bf16.gmra.mxu1 %v2790_v21 }
  0x77   : > { %1285 = vmatmul.bf16.gmra.mxu2 %v2806_v22  ;;  %1365 = vmatmul.bf16.gmra.mxu3 %v2822_v23 }
  0x86   : > { %1130 = vmatmul.bf16.gmra.mxu0 %v2775_v24  ;;  %1210 = vmatmul.bf16.gmra.mxu1 %v2791_v25 }
  0x87   : > { %1290 = vmatmul.bf16.gmra.mxu2 %v2807_v26  ;;  %1370 = vmatmul.bf16.gmra.mxu3 %v2823_v27 }
  0x96   : > { %1135 = vmatmul.bf16.gmra.mxu0 %v2776_v28  ;;  %1215 = vmatmul.bf16.gmra.mxu1 %v2792_v29 }
  0x97   : > { %1295 = vmatmul.bf16.gmra.mxu2 %v2808_v30  ;;  %1375 = vmatmul.bf16.gmra.mxu3 %v2824_v31 }
  0xa6   : > { %1140 = vmatmul.bf16.gmra.mxu0 %v2777_v32  ;;  %1220 = vmatmul.bf16.gmra.mxu1 %v2793_v33  ;;  %v2781_v33 = vld [vmem:[%s3647_s18 + $0x50] sm:$0xff] }
  0xa7   : > { %1300 = vmatmul.bf16.gmra.mxu2 %v2809_v34  ;;  %1380 = vmatmul.bf16.gmra.mxu3 %v2825_v35  ;;  %v2797_v34 = vld [vmem:[%s3647_s18 + $0xd0] sm:$0xff] }
  0xb6   : > { %1145 = vmatmul.bf16.gmra.mxu0 %v2778_v36  ;;  %1225 = vmatmul.bf16.gmra.mxu1 %v2794_v37 }
  0xb7   : > { %1305 = vmatmul.bf16.gmra.mxu2 %v2810_v38  ;;  %1385 = vmatmul.bf16.gmra.mxu3 %v2826_v39  ;;  %v2813_v39 = vld [vmem:[%s3647_s18 + $0x150] sm:$0xff] }
  0xc3   : > { %v1111_v42 = vpop.f32.mrf.mxu0  ;;  %v1191_v43 = vpop.f32.mrf.mxu1 }
  0xc4   : > { %v1822_v47 = vadd.f32 %v3693_v46, %v1111_v42  ;;  %v1854_v48 = vadd.f32 %v3693_v46, %v1191_v43 }
  0xc6   : > { %1150 = vmatmul.bf16.gmra.mxu0 %v2779_v40  ;;  %1230 = vmatmul.bf16.gmra.mxu1 %v2795_v41  ;;  %v1950_v55 = vmax.f32 %v1822_v47, 0.0  ;;  %v1982_v56 = vmax.f32 %v1854_v48, 0.0  ;;  %v2829_v40 = vld [vmem:[%s3647_s18 + $0x1d0] sm:$0xff] }
  0xc7   : > { %1310 = vmatmul.bf16.gmra.mxu2 %v2811_v44  ;;  %1390 = vmatmul.bf16.gmra.mxu3 %v2827_v45 }
  0xca   : > { %v1271_v49 = vpop.f32.mrf.mxu2  ;;  %v1351_v50 = vpop.f32.mrf.mxu3 }
  0xcb   : > { %v1113_v51 = vpop.f32.mrf.mxu0  ;;  %v1193_v52 = vpop.f32.mrf.mxu1  ;;  %v1886_v61 = vadd.f32 %v3693_v46, %v1271_v49  ;;  %v1918_v62 = vadd.f32 %v3693_v46, %v1351_v50 }
  0xcc   : > { %v1823_v53 = vadd.f32 %v3693_v46, %v1113_v51  ;;  %v1855_v54 = vadd.f32 %v3693_v46, %v1193_v52 }
  0xcd   : > { %v2014_v9 = vmax.f32 %v1886_v61, 0.0  ;;  %v2046_v10 = vmax.f32 %v1918_v62, 0.0 }
  0xce   : > { %v1951_v57 = vmax.f32 %v1823_v53, 0.0  ;;  %v1983_v58 = vmax.f32 %v1855_v54, 0.0 }
  0xd0   : > { %v2847_v59 = vpack.c.bf16 %v1951_v57, %v1950_v55  ;;  %v2927_v60 = vpack.c.bf16 %v1983_v58, %v1982_v56 }
  0xd2   : > { %2848 = vst [vmem:[%s3703_s20] sm:$0xff] %v2847_v59   ;;  %v1273_v63 = vpop.f32.mrf.mxu2  ;;  %v1353_v0 = vpop.f32.mrf.mxu3 }
  0xd3   : > { %3179 = vst [vmem:[%s3703_s20 + $0x80] sm:$0xff] %v2927_v60   ;;  %v1887_v3 = vadd.f32 %v3693_v46, %v1273_v63  ;;  %v1919_v4 = vadd.f32 %v3693_v46, %v1353_v0  ;;  %v1116_v5 = vpop.f32.mrf.mxu0  ;;  %v1196_v6 = vpop.f32.mrf.mxu1 }
  0xd4   : > { %v1824_v15 = vadd.f32 %v3693_v46, %v1116_v5  ;;  %v1856_v16 = vadd.f32 %v3693_v46, %v1196_v6 }
  0xd5   : > { %v2015_v11 = vmax.f32 %v1887_v3, 0.0  ;;  %v2047_v12 = vmax.f32 %v1919_v4, 0.0  ;;  %v2798_v3 = vld [vmem:[%s3647_s18 + $0xd8] sm:$0xff] }
  0xd6   : > { %1155 = vmatmul.bf16.gmra.mxu0 %v2780_v1  ;;  %1235 = vmatmul.bf16.gmra.mxu1 %v2796_v2  ;;  %v1952_v23 = vmax.f32 %v1824_v15, 0.0  ;;  %v1984_v24 = vmax.f32 %v1856_v16, 0.0  ;;  %v2782_v2 = vld [vmem:[%s3647_s18 + $0x58] sm:$0xff] }
  0xd7   : > { %v3007_v13 = vpack.c.bf16 %v2015_v11, %v2014_v9  ;;  %v3087_v14 = vpack.c.bf16 %v2047_v12, %v2046_v10  ;;  %1315 = vmatmul.bf16.gmra.mxu2 %v2812_v7  ;;  %1395 = vmatmul.bf16.gmra.mxu3 %v2828_v8  ;;  %v2814_v8 = vld [vmem:[%s3647_s18 + $0x158] sm:$0xff] }
  0xd8   : > { %v2830_v9 = vld [vmem:[%s3647_s18 + $0x1d8] sm:$0xff] }
  0xd9   : > { %3195 = vst [vmem:[%s3703_s20 + $0x100] sm:$0xff] %v3007_v13  }
  0xda   : > { %3211 = vst [vmem:[%s3703_s20 + $0x180] sm:$0xff] %v3087_v14   ;;  %v1276_v17 = vpop.f32.mrf.mxu2  ;;  %v1356_v18 = vpop.f32.mrf.mxu3 }
  0xdb   : > { %v1118_v19 = vpop.f32.mrf.mxu0  ;;  %v1198_v20 = vpop.f32.mrf.mxu1  ;;  %v1888_v29 = vadd.f32 %v3693_v46, %v1276_v17  ;;  %v1920_v30 = vadd.f32 %v3693_v46, %v1356_v18 }
  0xdc   : > { %v1825_v21 = vadd.f32 %v3693_v46, %v1118_v19  ;;  %v1857_v22 = vadd.f32 %v3693_v46, %v1198_v20 }
  0xdd   : > { %v2016_v41 = vmax.f32 %v1888_v29, 0.0  ;;  %v2048_v42 = vmax.f32 %v1920_v30, 0.0 }
  0xde   : > { %v1953_v25 = vmax.f32 %v1825_v21, 0.0  ;;  %v1985_v26 = vmax.f32 %v1857_v22, 0.0 }
  0xe0   : > { %v2852_v27 = vpack.c.bf16 %v1953_v25, %v1952_v23  ;;  %v2932_v28 = vpack.c.bf16 %v1985_v26, %v1984_v24 }
  0xe2   : > { %3164 = vst [vmem:[%s3703_s20 + $0x8] sm:$0xff] %v2852_v27   ;;  %v1278_v31 = vpop.f32.mrf.mxu2  ;;  %v1358_v32 = vpop.f32.mrf.mxu3 }
  0xe3   : > { %3180 = vst [vmem:[%s3703_s20 + $0x88] sm:$0xff] %v2932_v28   ;;  %v1889_v35 = vadd.f32 %v3693_v46, %v1278_v31  ;;  %v1921_v36 = vadd.f32 %v3693_v46, %v1358_v32  ;;  %v1121_v37 = vpop.f32.mrf.mxu0  ;;  %v1201_v38 = vpop.f32.mrf.mxu1 }
  0xe4   : > { %v1826_v48 = vadd.f32 %v3693_v46, %v1121_v37  ;;  %v1858_v49 = vadd.f32 %v3693_v46, %v1201_v38 }
  0xe5   : > { %v2017_v43 = vmax.f32 %v1889_v35, 0.0  ;;  %v2049_v44 = vmax.f32 %v1921_v36, 0.0  ;;  %v2799_v35 = vld [vmem:[%s3647_s18 + $0xe0] sm:$0xff] }
  0xe6   : > { %1160 = vmatmul.bf16.gmra.mxu0 %v2781_v33  ;;  %1240 = vmatmul.bf16.gmra.mxu1 %v2797_v34  ;;  %v1954_v56 = vmax.f32 %v1826_v48, 0.0  ;;  %v1986_v57 = vmax.f32 %v1858_v49, 0.0  ;;  %v2783_v34 = vld [vmem:[%s3647_s18 + $0x60] sm:$0xff] }
  0xe7   : > { %v3012_v45 = vpack.c.bf16 %v2017_v43, %v2016_v41  ;;  %v3092_v47 = vpack.c.bf16 %v2049_v44, %v2048_v42  ;;  %1320 = vmatmul.bf16.gmra.mxu2 %v2813_v39  ;;  %1400 = vmatmul.bf16.gmra.mxu3 %v2829_v40  ;;  %v2815_v40 = vld [vmem:[%s3647_s18 + $0x160] sm:$0xff] }
  0xe8   : > { %v2831_v41 = vld [vmem:[%s3647_s18 + $0x1e0] sm:$0xff] }
  0xe9   : > { %3196 = vst [vmem:[%s3703_s20 + $0x108] sm:$0xff] %v3012_v45  }
  0xea   : > { %3212 = vst [vmem:[%s3703_s20 + $0x188] sm:$0xff] %v3092_v47   ;;  %v1281_v50 = vpop.f32.mrf.mxu2  ;;  %v1361_v51 = vpop.f32.mrf.mxu3 }
  0xeb   : > { %v1123_v52 = vpop.f32.mrf.mxu0  ;;  %v1203_v53 = vpop.f32.mrf.mxu1  ;;  %v1890_v62 = vadd.f32 %v3693_v46, %v1281_v50  ;;  %v1922_v63 = vadd.f32 %v3693_v46, %v1361_v51 }
  0xec   : > { %v1827_v54 = vadd.f32 %v3693_v46, %v1123_v52  ;;  %v1859_v55 = vadd.f32 %v3693_v46, %v1203_v53 }
  0xed   : > { %v2018_v10 = vmax.f32 %v1890_v62, 0.0  ;;  %v2050_v11 = vmax.f32 %v1922_v63, 0.0 }
  0xee   : > { %v1955_v58 = vmax.f32 %v1827_v54, 0.0  ;;  %v1987_v59 = vmax.f32 %v1859_v55, 0.0 }
  0xf0   : > { %v2857_v60 = vpack.c.bf16 %v1955_v58, %v1954_v56  ;;  %v2937_v61 = vpack.c.bf16 %v1987_v59, %v1986_v57 }
  0xf2   : > { %3165 = vst [vmem:[%s3703_s20 + $0x10] sm:$0xff] %v2857_v60   ;;  %v1283_v0 = vpop.f32.mrf.mxu2  ;;  %v1363_v1 = vpop.f32.mrf.mxu3 }
  0xf3   : > { %3181 = vst [vmem:[%s3703_s20 + $0x90] sm:$0xff] %v2937_v61   ;;  %v1891_v4 = vadd.f32 %v3693_v46, %v1283_v0  ;;  %v1923_v5 = vadd.f32 %v3693_v46, %v1363_v1  ;;  %v1126_v6 = vpop.f32.mrf.mxu0  ;;  %v1206_v7 = vpop.f32.mrf.mxu1 }
  0xf4   : > { %v1828_v16 = vadd.f32 %v3693_v46, %v1126_v6  ;;  %v1860_v17 = vadd.f32 %v3693_v46, %v1206_v7 }
  0xf5   : > { %v2019_v12 = vmax.f32 %v1891_v4, 0.0  ;;  %v2051_v13 = vmax.f32 %v1923_v5, 0.0  ;;  %v2800_v4 = vld [vmem:[%s3647_s18 + $0xe8] sm:$0xff] }
  0xf6   : > { %1165 = vmatmul.bf16.gmra.mxu0 %v2782_v2  ;;  %1245 = vmatmul.bf16.gmra.mxu1 %v2798_v3  ;;  %v1956_v24 = vmax.f32 %v1828_v16, 0.0  ;;  %v1988_v25 = vmax.f32 %v1860_v17, 0.0  ;;  %v2784_v3 = vld [vmem:[%s3647_s18 + $0x68] sm:$0xff] }
  0xf7   : > { %v3017_v14 = vpack.c.bf16 %v2019_v12, %v2018_v10  ;;  %v3097_v15 = vpack.c.bf16 %v2051_v13, %v2050_v11  ;;  %1325 = vmatmul.bf16.gmra.mxu2 %v2814_v8  ;;  %1405 = vmatmul.bf16.gmra.mxu3 %v2830_v9  ;;  %v2816_v9 = vld [vmem:[%s3647_s18 + $0x168] sm:$0xff] }
  0xf8   : > { %v2832_v10 = vld [vmem:[%s3647_s18 + $0x1e8] sm:$0xff] }
  0xf9   : > { %3197 = vst [vmem:[%s3703_s20 + $0x110] sm:$0xff] %v3017_v14  }
  0xfa   : > { %3213 = vst [vmem:[%s3703_s20 + $0x190] sm:$0xff] %v3097_v15   ;;  %v1286_v18 = vpop.f32.mrf.mxu2  ;;  %v1366_v19 = vpop.f32.mrf.mxu3 }
  0xfb   : > { %v1128_v20 = vpop.f32.mrf.mxu0  ;;  %v1208_v21 = vpop.f32.mrf.mxu1  ;;  %v1892_v30 = vadd.f32 %v3693_v46, %v1286_v18  ;;  %v1924_v31 = vadd.f32 %v3693_v46, %v1366_v19 }
  0xfc   : > { %v1829_v22 = vadd.f32 %v3693_v46, %v1128_v20  ;;  %v1861_v23 = vadd.f32 %v3693_v46, %v1208_v21 }
  0xfd   : > { %v2020_v42 = vmax.f32 %v1892_v30, 0.0  ;;  %v2052_v43 = vmax.f32 %v1924_v31, 0.0 }
  0xfe   : > { %v1957_v26 = vmax.f32 %v1829_v22, 0.0  ;;  %v1989_v27 = vmax.f32 %v1861_v23, 0.0 }
 0x100   : > { %v2862_v28 = vpack.c.bf16 %v1957_v26, %v1956_v24  ;;  %v2942_v29 = vpack.c.bf16 %v1989_v27, %v1988_v25 }
 0x102   : > { %3166 = vst [vmem:[%s3703_s20 + $0x18] sm:$0xff] %v2862_v28   ;;  %v1288_v32 = vpop.f32.mrf.mxu2  ;;  %v1368_v33 = vpop.f32.mrf.mxu3 }
 0x103   : > { %3182 = vst [vmem:[%s3703_s20 + $0x98] sm:$0xff] %v2942_v29   ;;  %v1893_v36 = vadd.f32 %v3693_v46, %v1288_v32  ;;  %v1925_v37 = vadd.f32 %v3693_v46, %v1368_v33  ;;  %v1131_v38 = vpop.f32.mrf.mxu0  ;;  %v1211_v39 = vpop.f32.mrf.mxu1 }
 0x104   : > { %v1830_v49 = vadd.f32 %v3693_v46, %v1131_v38  ;;  %v1862_v50 = vadd.f32 %v3693_v46, %v1211_v39 }
 0x105   : > { %v2021_v44 = vmax.f32 %v1893_v36, 0.0  ;;  %v2053_v45 = vmax.f32 %v1925_v37, 0.0  ;;  %v2801_v36 = vld [vmem:[%s3647_s18 + $0xf0] sm:$0xff] }
 0x106   : > { %1170 = vmatmul.bf16.gmra.mxu0 %v2783_v34  ;;  %1250 = vmatmul.bf16.gmra.mxu1 %v2799_v35  ;;  %v1958_v57 = vmax.f32 %v1830_v49, 0.0  ;;  %v1990_v58 = vmax.f32 %v1862_v50, 0.0  ;;  %v2785_v35 = vld [vmem:[%s3647_s18 + $0x70] sm:$0xff] }
 0x107   : > { %v3022_v47 = vpack.c.bf16 %v2021_v44, %v2020_v42  ;;  %v3102_v48 = vpack.c.bf16 %v2053_v45, %v2052_v43  ;;  %1330 = vmatmul.bf16.gmra.mxu2 %v2815_v40  ;;  %1410 = vmatmul.bf16.gmra.mxu3 %v2831_v41  ;;  %v2817_v41 = vld [vmem:[%s3647_s18 + $0x170] sm:$0xff] }
 0x108   : > { %v2833_v42 = vld [vmem:[%s3647_s18 + $0x1f0] sm:$0xff] }
 0x109   : > { %3198 = vst [vmem:[%s3703_s20 + $0x118] sm:$0xff] %v3022_v47  }
 0x10a   : > { %3214 = vst [vmem:[%s3703_s20 + $0x198] sm:$0xff] %v3102_v48   ;;  %v1291_v51 = vpop.f32.mrf.mxu2  ;;  %v1371_v52 = vpop.f32.mrf.mxu3 }
 0x10b   : > { %v1133_v53 = vpop.f32.mrf.mxu0  ;;  %v1213_v54 = vpop.f32.mrf.mxu1  ;;  %v1894_v63 = vadd.f32 %v3693_v46, %v1291_v51  ;;  %v1926_v0 = vadd.f32 %v3693_v46, %v1371_v52 }
 0x10c   : > { %v1831_v55 = vadd.f32 %v3693_v46, %v1133_v53  ;;  %v1863_v56 = vadd.f32 %v3693_v46, %v1213_v54 }
 0x10d   : > { %v2022_v11 = vmax.f32 %v1894_v63, 0.0  ;;  %v2054_v12 = vmax.f32 %v1926_v0, 0.0 }
 0x10e   : > { %v1959_v59 = vmax.f32 %v1831_v55, 0.0  ;;  %v1991_v60 = vmax.f32 %v1863_v56, 0.0 }
 0x110   : > { %v2867_v61 = vpack.c.bf16 %v1959_v59, %v1958_v57  ;;  %v2947_v62 = vpack.c.bf16 %v1991_v60, %v1990_v58 }
 0x112   : > { %3167 = vst [vmem:[%s3703_s20 + $0x20] sm:$0xff] %v2867_v61   ;;  %v1293_v1 = vpop.f32.mrf.mxu2  ;;  %v1373_v2 = vpop.f32.mrf.mxu3 }
 0x113   : > { %3183 = vst [vmem:[%s3703_s20 + $0xa0] sm:$0xff] %v2947_v62   ;;  %v1895_v5 = vadd.f32 %v3693_v46, %v1293_v1  ;;  %v1927_v6 = vadd.f32 %v3693_v46, %v1373_v2  ;;  %v1136_v7 = vpop.f32.mrf.mxu0  ;;  %v1216_v8 = vpop.f32.mrf.mxu1 }
 0x114   : > { %v1832_v17 = vadd.f32 %v3693_v46, %v1136_v7  ;;  %v1864_v18 = vadd.f32 %v3693_v46, %v1216_v8 }
 0x115   : > { %v2023_v13 = vmax.f32 %v1895_v5, 0.0  ;;  %v2055_v14 = vmax.f32 %v1927_v6, 0.0  ;;  %v2802_v5 = vld [vmem:[%s3647_s18 + $0xf8] sm:$0xff] }
 0x116   : > { %1175 = vmatmul.bf16.gmra.mxu0 %v2784_v3  ;;  %1255 = vmatmul.bf16.gmra.mxu1 %v2800_v4  ;;  %v1960_v25 = vmax.f32 %v1832_v17, 0.0  ;;  %v1992_v26 = vmax.f32 %v1864_v18, 0.0  ;;  %v2786_v4 = vld [vmem:[%s3647_s18 + $0x78] sm:$0xff] }
 0x117   : > { %v3027_v15 = vpack.c.bf16 %v2023_v13, %v2022_v11  ;;  %v3107_v16 = vpack.c.bf16 %v2055_v14, %v2054_v12  ;;  %1335 = vmatmul.bf16.gmra.mxu2 %v2816_v9  ;;  %1415 = vmatmul.bf16.gmra.mxu3 %v2832_v10  ;;  %v2818_v10 = vld [vmem:[%s3647_s18 + $0x178] sm:$0xff] }
 0x118   : > { %v2834_v11 = vld [vmem:[%s3647_s18 + $0x1f8] sm:$0xff] }
 0x119   : > { %3199 = vst [vmem:[%s3703_s20 + $0x120] sm:$0xff] %v3027_v15  }
 0x11a   : > { %3215 = vst [vmem:[%s3703_s20 + $0x1a0] sm:$0xff] %v3107_v16   ;;  %v1296_v19 = vpop.f32.mrf.mxu2  ;;  %v1376_v20 = vpop.f32.mrf.mxu3 }
 0x11b   : > { %v1138_v21 = vpop.f32.mrf.mxu0  ;;  %v1218_v22 = vpop.f32.mrf.mxu1  ;;  %v1896_v31 = vadd.f32 %v3693_v46, %v1296_v19  ;;  %v1928_v32 = vadd.f32 %v3693_v46, %v1376_v20 }
 0x11c   : > { %v1833_v23 = vadd.f32 %v3693_v46, %v1138_v21  ;;  %v1865_v24 = vadd.f32 %v3693_v46, %v1218_v22 }
 0x11d   : > { %v2024_v43 = vmax.f32 %v1896_v31, 0.0  ;;  %v2056_v44 = vmax.f32 %v1928_v32, 0.0 }
 0x11e   : > { %v1961_v27 = vmax.f32 %v1833_v23, 0.0  ;;  %v1993_v28 = vmax.f32 %v1865_v24, 0.0 }
 0x120   : > { %v2872_v29 = vpack.c.bf16 %v1961_v27, %v1960_v25  ;;  %v2952_v30 = vpack.c.bf16 %v1993_v28, %v1992_v26 }
 0x122   : > { %3168 = vst [vmem:[%s3703_s20 + $0x28] sm:$0xff] %v2872_v29   ;;  %v1298_v33 = vpop.f32.mrf.mxu2  ;;  %v1378_v34 = vpop.f32.mrf.mxu3 }
 0x123   : > { %3184 = vst [vmem:[%s3703_s20 + $0xa8] sm:$0xff] %v2952_v30   ;;  %v1897_v37 = vadd.f32 %v3693_v46, %v1298_v33  ;;  %v1929_v38 = vadd.f32 %v3693_v46, %v1378_v34  ;;  %v1141_v39 = vpop.f32.mrf.mxu0  ;;  %v1221_v40 = vpop.f32.mrf.mxu1 }
 0x124   : > { %v1834_v50 = vadd.f32 %v3693_v46, %v1141_v39  ;;  %v1866_v51 = vadd.f32 %v3693_v46, %v1221_v40 }
 0x125   : > { %v2025_v45 = vmax.f32 %v1897_v37, 0.0  ;;  %v2057_v47 = vmax.f32 %v1929_v38, 0.0 }
 0x126   : > { %1180 = vmatmul.bf16.gmra.mxu0 %v2785_v35  ;;  %1260 = vmatmul.bf16.gmra.mxu1 %v2801_v36  ;;  %v1962_v58 = vmax.f32 %v1834_v50, 0.0  ;;  %v1994_v59 = vmax.f32 %v1866_v51, 0.0 }
 0x127   : > { %v3032_v48 = vpack.c.bf16 %v2025_v45, %v2024_v43  ;;  %v3112_v49 = vpack.c.bf16 %v2057_v47, %v2056_v44  ;;  %1340 = vmatmul.bf16.gmra.mxu2 %v2817_v41  ;;  %1420 = vmatmul.bf16.gmra.mxu3 %v2833_v42 }
 0x129   : > { %3200 = vst [vmem:[%s3703_s20 + $0x128] sm:$0xff] %v3032_v48  }
 0x12a   : > { %3216 = vst [vmem:[%s3703_s20 + $0x1a8] sm:$0xff] %v3112_v49   ;;  %v1301_v52 = vpop.f32.mrf.mxu2  ;;  %v1381_v53 = vpop.f32.mrf.mxu3 }
 0x12b   : > { %v1143_v54 = vpop.f32.mrf.mxu0  ;;  %v1223_v55 = vpop.f32.mrf.mxu1  ;;  %v1898_v0 = vadd.f32 %v3693_v46, %v1301_v52  ;;  %v1930_v1 = vadd.f32 %v3693_v46, %v1381_v53 }
 0x12c   : > { %v1835_v56 = vadd.f32 %v3693_v46, %v1143_v54  ;;  %v1867_v57 = vadd.f32 %v3693_v46, %v1223_v55 }
 0x12d   : > { %v2026_v12 = vmax.f32 %v1898_v0, 0.0  ;;  %v2058_v13 = vmax.f32 %v1930_v1, 0.0 }
 0x12e   : > { %v1963_v60 = vmax.f32 %v1835_v56, 0.0  ;;  %v1995_v61 = vmax.f32 %v1867_v57, 0.0 }
 0x130   : > { %v2877_v62 = vpack.c.bf16 %v1963_v60, %v1962_v58  ;;  %v2957_v63 = vpack.c.bf16 %v1995_v61, %v1994_v59 }
 0x132   : > { %3169 = vst [vmem:[%s3703_s20 + $0x30] sm:$0xff] %v2877_v62   ;;  %v1303_v2 = vpop.f32.mrf.mxu2  ;;  %v1383_v3 = vpop.f32.mrf.mxu3 }
 0x133   : > { %3185 = vst [vmem:[%s3703_s20 + $0xb0] sm:$0xff] %v2957_v63   ;;  %v1899_v6 = vadd.f32 %v3693_v46, %v1303_v2  ;;  %v1931_v7 = vadd.f32 %v3693_v46, %v1383_v3  ;;  %v1146_v8 = vpop.f32.mrf.mxu0  ;;  %v1226_v9 = vpop.f32.mrf.mxu1 }
 0x134   : > { %v1836_v18 = vadd.f32 %v3693_v46, %v1146_v8  ;;  %v1868_v19 = vadd.f32 %v3693_v46, %v1226_v9 }
 0x135   : > { %v2027_v14 = vmax.f32 %v1899_v6, 0.0  ;;  %v2059_v15 = vmax.f32 %v1931_v7, 0.0 }
 0x136   : > { %1185 = vmatmul.bf16.gmra.mxu0 %v2786_v4  ;;  %1265 = vmatmul.bf16.gmra.mxu1 %v2802_v5  ;;  %v1964_v26 = vmax.f32 %v1836_v18, 0.0  ;;  %v1996_v27 = vmax.f32 %v1868_v19, 0.0 }
 0x137   : > { %v3037_v16 = vpack.c.bf16 %v2027_v14, %v2026_v12  ;;  %v3117_v17 = vpack.c.bf16 %v2059_v15, %v2058_v13  ;;  %1345 = vmatmul.bf16.gmra.mxu2 %v2818_v10  ;;  %1425 = vmatmul.bf16.gmra.mxu3 %v2834_v11 }
 0x139   : > { %3201 = vst [vmem:[%s3703_s20 + $0x130] sm:$0xff] %v3037_v16  }
 0x13a   : > { %3217 = vst [vmem:[%s3703_s20 + $0x1b0] sm:$0xff] %v3117_v17   ;;  %v1306_v20 = vpop.f32.mrf.mxu2  ;;  %v1386_v21 = vpop.f32.mrf.mxu3 }
 0x13b   : > { %v1148_v22 = vpop.f32.mrf.mxu0  ;;  %v1228_v23 = vpop.f32.mrf.mxu1  ;;  %v1900_v32 = vadd.f32 %v3693_v46, %v1306_v20  ;;  %v1932_v33 = vadd.f32 %v3693_v46, %v1386_v21 }
 0x13c   : > { %v1837_v24 = vadd.f32 %v3693_v46, %v1148_v22  ;;  %v1869_v25 = vadd.f32 %v3693_v46, %v1228_v23 }
 0x13d   : > { %v2028_v40 = vmax.f32 %v1900_v32, 0.0  ;;  %v2060_v41 = vmax.f32 %v1932_v33, 0.0 }
 0x13e   : > { %v1965_v28 = vmax.f32 %v1837_v24, 0.0  ;;  %v1997_v29 = vmax.f32 %v1869_v25, 0.0 }
 0x140   : > { %v2882_v30 = vpack.c.bf16 %v1965_v28, %v1964_v26  ;;  %v2962_v31 = vpack.c.bf16 %v1997_v29, %v1996_v27 }
 0x142   : > { %3170 = vst [vmem:[%s3703_s20 + $0x38] sm:$0xff] %v2882_v30   ;;  %v1308_v34 = vpop.f32.mrf.mxu2  ;;  %v1388_v35 = vpop.f32.mrf.mxu3 }
 0x143   : > { %3186 = vst [vmem:[%s3703_s20 + $0xb8] sm:$0xff] %v2962_v31   ;;  %v1901_v36 = vadd.f32 %v3693_v46, %v1308_v34  ;;  %v1933_v37 = vadd.f32 %v3693_v46, %v1388_v35  ;;  %v1151_v38 = vpop.f32.mrf.mxu0  ;;  %v1231_v39 = vpop.f32.mrf.mxu1 }
 0x144   : > { %v1838_v47 = vadd.f32 %v3693_v46, %v1151_v38  ;;  %v1870_v48 = vadd.f32 %v3693_v46, %v1231_v39 }
 0x145   : > { %v2029_v42 = vmax.f32 %v1901_v36, 0.0  ;;  %v2061_v43 = vmax.f32 %v1933_v37, 0.0 }
 0x146   : > { %v1966_v55 = vmax.f32 %v1838_v47, 0.0  ;;  %v1998_v56 = vmax.f32 %v1870_v48, 0.0 }
 0x147   : > { %v3042_v44 = vpack.c.bf16 %v2029_v42, %v2028_v40  ;;  %v3122_v45 = vpack.c.bf16 %v2061_v43, %v2060_v41 }
 0x149   : > { %3202 = vst [vmem:[%s3703_s20 + $0x138] sm:$0xff] %v3042_v44  }
 0x14a   : > { %3218 = vst [vmem:[%s3703_s20 + $0x1b8] sm:$0xff] %v3122_v45   ;;  %v1311_v49 = vpop.f32.mrf.mxu2  ;;  %v1391_v50 = vpop.f32.mrf.mxu3 }
 0x14b   : > { %v1153_v51 = vpop.f32.mrf.mxu0  ;;  %v1233_v52 = vpop.f32.mrf.mxu1  ;;  %v1902_v61 = vadd.f32 %v3693_v46, %v1311_v49  ;;  %v1934_v62 = vadd.f32 %v3693_v46, %v1391_v50 }
 0x14c   : > { %v1839_v53 = vadd.f32 %v3693_v46, %v1153_v51  ;;  %v1871_v54 = vadd.f32 %v3693_v46, %v1233_v52 }
 0x14d   : > { %v2030_v5 = vmax.f32 %v1902_v61, 0.0  ;;  %v2062_v6 = vmax.f32 %v1934_v62, 0.0 }
 0x14e   : > { %v1967_v57 = vmax.f32 %v1839_v53, 0.0  ;;  %v1999_v58 = vmax.f32 %v1871_v54, 0.0 }
 0x150   : > { %v2887_v59 = vpack.c.bf16 %v1967_v57, %v1966_v55  ;;  %v2967_v60 = vpack.c.bf16 %v1999_v58, %v1998_v56 }
 0x152   : > { %3171 = vst [vmem:[%s3703_s20 + $0x40] sm:$0xff] %v2887_v59   ;;  %v1313_v63 = vpop.f32.mrf.mxu2  ;;  %v1393_v0 = vpop.f32.mrf.mxu3 }
 0x153   : > { %3187 = vst [vmem:[%s3703_s20 + $0xc0] sm:$0xff] %v2967_v60   ;;  %v1903_v1 = vadd.f32 %v3693_v46, %v1313_v63  ;;  %v1935_v2 = vadd.f32 %v3693_v46, %v1393_v0  ;;  %v1156_v3 = vpop.f32.mrf.mxu0  ;;  %v1236_v4 = vpop.f32.mrf.mxu1 }
 0x154   : > { %v1840_v11 = vadd.f32 %v3693_v46, %v1156_v3  ;;  %v1872_v12 = vadd.f32 %v3693_v46, %v1236_v4 }
 0x155   : > { %v2031_v7 = vmax.f32 %v1903_v1, 0.0  ;;  %v2063_v8 = vmax.f32 %v1935_v2, 0.0 }
 0x156   : > { %v1968_v19 = vmax.f32 %v1840_v11, 0.0  ;;  %v2000_v20 = vmax.f32 %v1872_v12, 0.0 }
 0x157   : > { %v3047_v9 = vpack.c.bf16 %v2031_v7, %v2030_v5  ;;  %v3127_v10 = vpack.c.bf16 %v2063_v8, %v2062_v6 }
 0x159   : > { %3203 = vst [vmem:[%s3703_s20 + $0x140] sm:$0xff] %v3047_v9  }
 0x15a   : > { %3219 = vst [vmem:[%s3703_s20 + $0x1c0] sm:$0xff] %v3127_v10   ;;  %v1316_v13 = vpop.f32.mrf.mxu2  ;;  %v1396_v14 = vpop.f32.mrf.mxu3 }
 0x15b   : > { %v1158_v15 = vpop.f32.mrf.mxu0  ;;  %v1238_v16 = vpop.f32.mrf.mxu1  ;;  %v1904_v25 = vadd.f32 %v3693_v46, %v1316_v13  ;;  %v1936_v26 = vadd.f32 %v3693_v46, %v1396_v14 }
 0x15c   : > { %v1841_v17 = vadd.f32 %v3693_v46, %v1158_v15  ;;  %v1873_v18 = vadd.f32 %v3693_v46, %v1238_v16 }
 0x15d   : > { %v2032_v33 = vmax.f32 %v1904_v25, 0.0  ;;  %v2064_v34 = vmax.f32 %v1936_v26, 0.0 }
 0x15e   : > { %v1969_v21 = vmax.f32 %v1841_v17, 0.0  ;;  %v2001_v22 = vmax.f32 %v1873_v18, 0.0 }
 0x160   : > { %v2892_v23 = vpack.c.bf16 %v1969_v21, %v1968_v19  ;;  %v2972_v24 = vpack.c.bf16 %v2001_v22, %v2000_v20 }
 0x162   : > { %3172 = vst [vmem:[%s3703_s20 + $0x48] sm:$0xff] %v2892_v23   ;;  %v1318_v27 = vpop.f32.mrf.mxu2  ;;  %v1398_v28 = vpop.f32.mrf.mxu3 }
 0x163   : > { %3188 = vst [vmem:[%s3703_s20 + $0xc8] sm:$0xff] %v2972_v24   ;;  %v1905_v29 = vadd.f32 %v3693_v46, %v1318_v27  ;;  %v1937_v30 = vadd.f32 %v3693_v46, %v1398_v28  ;;  %v1161_v31 = vpop.f32.mrf.mxu0  ;;  %v1241_v32 = vpop.f32.mrf.mxu1 }
 0x164   : > { %v1842_v39 = vadd.f32 %v3693_v46, %v1161_v31  ;;  %v1874_v40 = vadd.f32 %v3693_v46, %v1241_v32 }
 0x165   : > { %v2033_v35 = vmax.f32 %v1905_v29, 0.0  ;;  %v2065_v36 = vmax.f32 %v1937_v30, 0.0 }
 0x166   : > { %v1970_v48 = vmax.f32 %v1842_v39, 0.0  ;;  %v2002_v49 = vmax.f32 %v1874_v40, 0.0 }
 0x167   : > { %v3052_v37 = vpack.c.bf16 %v2033_v35, %v2032_v33  ;;  %v3132_v38 = vpack.c.bf16 %v2065_v36, %v2064_v34 }
 0x169   : > { %3204 = vst [vmem:[%s3703_s20 + $0x148] sm:$0xff] %v3052_v37  }
 0x16a   : > { %3220 = vst [vmem:[%s3703_s20 + $0x1c8] sm:$0xff] %v3132_v38   ;;  %v1321_v41 = vpop.f32.mrf.mxu2  ;;  %v1401_v42 = vpop.f32.mrf.mxu3 }
 0x16b   : > { %v1163_v43 = vpop.f32.mrf.mxu0  ;;  %v1243_v44 = vpop.f32.mrf.mxu1  ;;  %v1906_v54 = vadd.f32 %v3693_v46, %v1321_v41  ;;  %v1938_v55 = vadd.f32 %v3693_v46, %v1401_v42 }
 0x16c   : > { %v1843_v45 = vadd.f32 %v3693_v46, %v1163_v43  ;;  %v1875_v47 = vadd.f32 %v3693_v46, %v1243_v44 }
 0x16d   : > { %v2034_v62 = vmax.f32 %v1906_v54, 0.0  ;;  %v2066_v63 = vmax.f32 %v1938_v55, 0.0 }
 0x16e   : > { %v1971_v50 = vmax.f32 %v1843_v45, 0.0  ;;  %v2003_v51 = vmax.f32 %v1875_v47, 0.0 }
 0x170   : > { %v2897_v52 = vpack.c.bf16 %v1971_v50, %v1970_v48  ;;  %v2977_v53 = vpack.c.bf16 %v2003_v51, %v2002_v49 }
 0x172   : > { %3173 = vst [vmem:[%s3703_s20 + $0x50] sm:$0xff] %v2897_v52   ;;  %v1323_v56 = vpop.f32.mrf.mxu2  ;;  %v1403_v57 = vpop.f32.mrf.mxu3 }
 0x173   : > { %3189 = vst [vmem:[%s3703_s20 + $0xd0] sm:$0xff] %v2977_v53   ;;  %v1907_v58 = vadd.f32 %v3693_v46, %v1323_v56  ;;  %v1939_v59 = vadd.f32 %v3693_v46, %v1403_v57  ;;  %v1166_v60 = vpop.f32.mrf.mxu0  ;;  %v1246_v61 = vpop.f32.mrf.mxu1 }
 0x174   : > { %v1844_v4 = vadd.f32 %v3693_v46, %v1166_v60  ;;  %v1876_v5 = vadd.f32 %v3693_v46, %v1246_v61 }
 0x175   : > { %v2035_v0 = vmax.f32 %v1907_v58, 0.0  ;;  %v2067_v1 = vmax.f32 %v1939_v59, 0.0 }
 0x176   : > { %v1972_v12 = vmax.f32 %v1844_v4, 0.0  ;;  %v2004_v13 = vmax.f32 %v1876_v5, 0.0 }
 0x177   : > { %v3057_v2 = vpack.c.bf16 %v2035_v0, %v2034_v62  ;;  %v3137_v3 = vpack.c.bf16 %v2067_v1, %v2066_v63 }
 0x179   : > { %3205 = vst [vmem:[%s3703_s20 + $0x150] sm:$0xff] %v3057_v2  }
 0x17a   : > { %3221 = vst [vmem:[%s3703_s20 + $0x1d0] sm:$0xff] %v3137_v3   ;;  %v1326_v6 = vpop.f32.mrf.mxu2  ;;  %v1406_v7 = vpop.f32.mrf.mxu3 }
 0x17b   : > { %v1168_v8 = vpop.f32.mrf.mxu0  ;;  %v1248_v9 = vpop.f32.mrf.mxu1  ;;  %v1908_v18 = vadd.f32 %v3693_v46, %v1326_v6  ;;  %v1940_v19 = vadd.f32 %v3693_v46, %v1406_v7 }
 0x17c   : > { %v1845_v10 = vadd.f32 %v3693_v46, %v1168_v8  ;;  %v1877_v11 = vadd.f32 %v3693_v46, %v1248_v9 }
 0x17d   : > { %v2036_v26 = vmax.f32 %v1908_v18, 0.0  ;;  %v2068_v27 = vmax.f32 %v1940_v19, 0.0 }
 0x17e   : > { %v1973_v14 = vmax.f32 %v1845_v10, 0.0  ;;  %v2005_v15 = vmax.f32 %v1877_v11, 0.0 }
 0x180   : > { %v2902_v16 = vpack.c.bf16 %v1973_v14, %v1972_v12  ;;  %v2982_v17 = vpack.c.bf16 %v2005_v15, %v2004_v13 }
 0x182   : > { %3174 = vst [vmem:[%s3703_s20 + $0x58] sm:$0xff] %v2902_v16   ;;  %v1328_v20 = vpop.f32.mrf.mxu2  ;;  %v1408_v21 = vpop.f32.mrf.mxu3 }
 0x183   : > { %3190 = vst [vmem:[%s3703_s20 + $0xd8] sm:$0xff] %v2982_v17   ;;  %v1909_v22 = vadd.f32 %v3693_v46, %v1328_v20  ;;  %v1941_v23 = vadd.f32 %v3693_v46, %v1408_v21  ;;  %v1171_v24 = vpop.f32.mrf.mxu0  ;;  %v1251_v25 = vpop.f32.mrf.mxu1 }
 0x184   : > { %v1846_v32 = vadd.f32 %v3693_v46, %v1171_v24  ;;  %v1878_v33 = vadd.f32 %v3693_v46, %v1251_v25 }
 0x185   : > { %v2037_v28 = vmax.f32 %v1909_v22, 0.0  ;;  %v2069_v29 = vmax.f32 %v1941_v23, 0.0 }
 0x186   : > { %v1974_v40 = vmax.f32 %v1846_v32, 0.0  ;;  %v2006_v41 = vmax.f32 %v1878_v33, 0.0 }
 0x187   : > { %v3062_v30 = vpack.c.bf16 %v2037_v28, %v2036_v26  ;;  %v3142_v31 = vpack.c.bf16 %v2069_v29, %v2068_v27 }
 0x189   : > { %3206 = vst [vmem:[%s3703_s20 + $0x158] sm:$0xff] %v3062_v30  }
 0x18a   : > { %3222 = vst [vmem:[%s3703_s20 + $0x1d8] sm:$0xff] %v3142_v31   ;;  %v1331_v34 = vpop.f32.mrf.mxu2  ;;  %v1411_v35 = vpop.f32.mrf.mxu3  ;;  %v3339_v31 = vld [vmem:[#allocation8] ss:$0 sm:$0xff] }
 0x18b   : > { %v1173_v36 = vpop.f32.mrf.mxu0  ;;  %v1253_v37 = vpop.f32.mrf.mxu1  ;;  %v1910_v47 = vadd.f32 %v3693_v46, %v1331_v34  ;;  %v1942_v48 = vadd.f32 %v3693_v46, %v1411_v35 }
 0x18c   : > { %v1847_v38 = vadd.f32 %v3693_v46, %v1173_v36  ;;  %v1879_v39 = vadd.f32 %v3693_v46, %v1253_v37 }
 0x18d   : > { %v2038_v55 = vmax.f32 %v1910_v47, 0.0  ;;  %v2070_v56 = vmax.f32 %v1942_v48, 0.0 }
 0x18e   : > { %v1975_v42 = vmax.f32 %v1847_v38, 0.0  ;;  %v2007_v43 = vmax.f32 %v1879_v39, 0.0 }
 0x190   : > { %v2907_v44 = vpack.c.bf16 %v1975_v42, %v1974_v40  ;;  %v2987_v45 = vpack.c.bf16 %v2007_v43, %v2006_v41 }
 0x192   : > { %3175 = vst [vmem:[%s3703_s20 + $0x60] sm:$0xff] %v2907_v44   ;;  %v1333_v49 = vpop.f32.mrf.mxu2  ;;  %v1413_v50 = vpop.f32.mrf.mxu3 }
 0x193   : > { %3191 = vst [vmem:[%s3703_s20 + $0xe0] sm:$0xff] %v2987_v45   ;;  %v1911_v51 = vadd.f32 %v3693_v46, %v1333_v49  ;;  %v1943_v52 = vadd.f32 %v3693_v46, %v1413_v50  ;;  %v1176_v53 = vpop.f32.mrf.mxu0  ;;  %v1256_v54 = vpop.f32.mrf.mxu1 }
 0x194   : > { %v1848_v61 = vadd.f32 %v3693_v46, %v1176_v53  ;;  %v1880_v62 = vadd.f32 %v3693_v46, %v1256_v54 }
 0x195   : > { %v2039_v57 = vmax.f32 %v1911_v51, 0.0  ;;  %v2071_v58 = vmax.f32 %v1943_v52, 0.0 }
 0x196   : > { %v1976_v5 = vmax.f32 %v1848_v61, 0.0  ;;  %v2008_v6 = vmax.f32 %v1880_v62, 0.0 }
 0x197   : > { %v3067_v59 = vpack.c.bf16 %v2039_v57, %v2038_v55  ;;  %v3147_v60 = vpack.c.bf16 %v2071_v58, %v2070_v56 }
 0x199   : > { %3207 = vst [vmem:[%s3703_s20 + $0x160] sm:$0xff] %v3067_v59  }
 0x19a   : > { %3223 = vst [vmem:[%s3703_s20 + $0x1e0] sm:$0xff] %v3147_v60   ;;  %v1336_v63 = vpop.f32.mrf.mxu2  ;;  %v1416_v0 = vpop.f32.mrf.mxu3 }
 0x19b   : > { %v1178_v1 = vpop.f32.mrf.mxu0  ;;  %v1258_v2 = vpop.f32.mrf.mxu1  ;;  %v1912_v11 = vadd.f32 %v3693_v46, %v1336_v63  ;;  %v1944_v12 = vadd.f32 %v3693_v46, %v1416_v0 }
 0x19c   : > { %v1849_v3 = vadd.f32 %v3693_v46, %v1178_v1  ;;  %v1881_v4 = vadd.f32 %v3693_v46, %v1258_v2 }
 0x19d   : > { %v2040_v19 = vmax.f32 %v1912_v11, 0.0  ;;  %v2072_v20 = vmax.f32 %v1944_v12, 0.0 }
 0x19e   : > { %v1977_v7 = vmax.f32 %v1849_v3, 0.0  ;;  %v2009_v8 = vmax.f32 %v1881_v4, 0.0 }
 0x1a0   : > { %v2912_v9 = vpack.c.bf16 %v1977_v7, %v1976_v5  ;;  %v2992_v10 = vpack.c.bf16 %v2009_v8, %v2008_v6 }
 0x1a2   : > { %3176 = vst [vmem:[%s3703_s20 + $0x68] sm:$0xff] %v2912_v9   ;;  %v1338_v13 = vpop.f32.mrf.mxu2  ;;  %v1418_v14 = vpop.f32.mrf.mxu3 }
 0x1a3   : > { %3192 = vst [vmem:[%s3703_s20 + $0xe8] sm:$0xff] %v2992_v10   ;;  %v1913_v15 = vadd.f32 %v3693_v46, %v1338_v13  ;;  %v1945_v16 = vadd.f32 %v3693_v46, %v1418_v14  ;;  %v1181_v17 = vpop.f32.mrf.mxu0  ;;  %v1261_v18 = vpop.f32.mrf.mxu1 }
 0x1a4   : > { %v1850_v25 = vadd.f32 %v3693_v46, %v1181_v17  ;;  %v1882_v26 = vadd.f32 %v3693_v46, %v1261_v18 }
 0x1a5   : > { %v2041_v21 = vmax.f32 %v1913_v15, 0.0  ;;  %v2073_v22 = vmax.f32 %v1945_v16, 0.0 }
 0x1a6   : > { %v1978_v34 = vmax.f32 %v1850_v25, 0.0  ;;  %v2010_v35 = vmax.f32 %v1882_v26, 0.0 }
 0x1a7   : > { %v3072_v23 = vpack.c.bf16 %v2041_v21, %v2040_v19  ;;  %v3152_v24 = vpack.c.bf16 %v2073_v22, %v2072_v20 }
 0x1a9   : > { %3208 = vst [vmem:[%s3703_s20 + $0x168] sm:$0xff] %v3072_v23  }
 0x1aa   : > { %3224 = vst [vmem:[%s3703_s20 + $0x1e8] sm:$0xff] %v3152_v24   ;;  %v1341_v27 = vpop.f32.mrf.mxu2  ;;  %v1421_v28 = vpop.f32.mrf.mxu3 }
 0x1ab   : > { %v1183_v29 = vpop.f32.mrf.mxu0  ;;  %v1263_v30 = vpop.f32.mrf.mxu1  ;;  %v1914_v40 = vadd.f32 %v3339_v31, %v1341_v27  ;;  %v1946_v41 = vadd.f32 %v3339_v31, %v1421_v28 }
 0x1ac   : > { %v1851_v32 = vadd.f32 %v3339_v31, %v1183_v29  ;;  %v1883_v33 = vadd.f32 %v3339_v31, %v1263_v30 }
 0x1ad   : > { %v2042_v48 = vmax.f32 %v1914_v40, 0.0  ;;  %v2074_v49 = vmax.f32 %v1946_v41, 0.0 }
 0x1ae   : > { %v1979_v36 = vmax.f32 %v1851_v32, 0.0  ;;  %v2011_v37 = vmax.f32 %v1883_v33, 0.0 }
 0x1b0   : > { %v2917_v38 = vpack.c.bf16 %v1979_v36, %v1978_v34  ;;  %v2997_v39 = vpack.c.bf16 %v2011_v37, %v2010_v35 }
 0x1b2   : > { %3177 = vst [vmem:[%s3703_s20 + $0x70] sm:$0xff] %v2917_v38   ;;  %v1343_v46 = vpop.f32.mrf.mxu2  ;;  %v1423_v42 = vpop.f32.mrf.mxu3 }
 0x1b3   : > { %3193 = vst [vmem:[%s3703_s20 + $0xf0] sm:$0xff] %v2997_v39   ;;  %v1915_v43 = vadd.f32 %v3339_v31, %v1343_v46  ;;  %v1947_v44 = vadd.f32 %v3339_v31, %v1423_v42  ;;  %v1186_v45 = vpop.f32.mrf.mxu0  ;;  %v1266_v47 = vpop.f32.mrf.mxu1 }
 0x1b4   : > { %v1852_v54 = vadd.f32 %v3339_v31, %v1186_v45  ;;  %v1884_v55 = vadd.f32 %v3339_v31, %v1266_v47 }
 0x1b5   : > { %v2043_v50 = vmax.f32 %v1915_v43, 0.0  ;;  %v2075_v51 = vmax.f32 %v1947_v44, 0.0 }
 0x1b6   : > { %v1980_v62 = vmax.f32 %v1852_v54, 0.0  ;;  %v2012_v63 = vmax.f32 %v1884_v55, 0.0 }
 0x1b7   : > { %v3077_v52 = vpack.c.bf16 %v2043_v50, %v2042_v48  ;;  %v3157_v53 = vpack.c.bf16 %v2075_v51, %v2074_v49 }
 0x1b9   : > { %3209 = vst [vmem:[%s3703_s20 + $0x170] sm:$0xff] %v3077_v52  }
 0x1ba   : > { %3225 = vst [vmem:[%s3703_s20 + $0x1f0] sm:$0xff] %v3157_v53   ;;  %v1346_v56 = vpop.f32.mrf.mxu2  ;;  %v1426_v57 = vpop.f32.mrf.mxu3 }
 0x1bb   : > { %v1188_v58 = vpop.f32.mrf.mxu0  ;;  %v1268_v59 = vpop.f32.mrf.mxu1  ;;  %v1916_v4 = vadd.f32 %v3339_v31, %v1346_v56  ;;  %v1948_v5 = vadd.f32 %v3339_v31, %v1426_v57 }
 0x1bc   : > { %v1853_v60 = vadd.f32 %v3339_v31, %v1188_v58  ;;  %v1885_v61 = vadd.f32 %v3339_v31, %v1268_v59 }
 0x1bd   : > { %v2044_v10 = vmax.f32 %v1916_v4, 0.0  ;;  %v2076_v11 = vmax.f32 %v1948_v5, 0.0 }
 0x1be   : > { %v1981_v0 = vmax.f32 %v1853_v60, 0.0  ;;  %v2013_v1 = vmax.f32 %v1885_v61, 0.0 }
 0x1c0   : > { %v2922_v2 = vpack.c.bf16 %v1981_v0, %v1980_v62  ;;  %v3002_v3 = vpack.c.bf16 %v2013_v1, %v2012_v63 }
 0x1c2   : > { %3178 = vst [vmem:[%s3703_s20 + $0x78] sm:$0xff] %v2922_v2   ;;  %v1348_v6 = vpop.f32.mrf.mxu2  ;;  %v1428_v7 = vpop.f32.mrf.mxu3 }
 0x1c3   : > { %3194 = vst [vmem:[%s3703_s20 + $0xf8] sm:$0xff] %v3002_v3   ;;  %v1917_v8 = vadd.f32 %v3339_v31, %v1348_v6  ;;  %v1949_v9 = vadd.f32 %v3339_v31, %v1428_v7 }
 0x1c5   : > { %v2045_v12 = vmax.f32 %v1917_v8, 0.0  ;;  %v2077_v13 = vmax.f32 %v1949_v9, 0.0 }
 0x1c7   : > { %v3082_v14 = vpack.c.bf16 %v2045_v12, %v2044_v10  ;;  %v3162_v15 = vpack.c.bf16 %v2077_v13, %v2076_v11 }
 0x1c9   : > { %3210 = vst [vmem:[%s3703_s20 + $0x178] sm:$0xff] %v3082_v14  }
 0x1ca   : > { %3226 = vst [vmem:[%s3703_s20 + $0x1f8] sm:$0xff] %v3162_v15  }
 0x1cb   : > { %3457 = shalt.err (!%p3454_p12)
}
 0x1cc   : > { %s3522_s10 = smov 64   ;;  %s3523_s24 = smov 4  }
 0x1cd   : > { %3261 = dma.vmem_to_hbm [thread:$0]  (%p3618_p0), %s2349_s23, 8192, %s2351_s27, %s2335_s15, %s3522_s10, %s3522_s10, %s3523_s24  }
 0x1ce PF: > { %p3283_p13 = scmp.ge.s32.totalorder %s3516_s17, 2  ;;  %s2365_s18 = sand.u32 1, %s3496_s12  }
 0x1cf   : > { %s2366_s20 = scalar_lea.sflag [#allocation5], %s2365_s18 }
 0x1d0   : > { %p3275_p2 = pnand %p3283_p13, %p3589_p5 }
 0x1d2   : > { %p3276_p4 = pneg %p3275_p2 }
 0x1d4   : > { %3491 = dma.done.wait (%p3276_p4), %s2366_s20, 8192  }
 0x1d5   : > { %3493 = vsyncadd (%p3276_p4), %s2366_s20, 4294959104  ;;  %s20_s17 = sadd.s32 1, %s3516_s17   ;;  %s3952_s12 = smov %s3500_s13 }
 0x1d6   : > { %p17_p6 = scmp.ge.s32.totalorder %s20_s17, 10   ;;  %s3953_s13 = smov %s3504_s14 }
 0x1d7   : > { %s3954_s14 = smov %s3628_s25  ;;  %s3955_s15 = smov %s3512_s16 }
 0x1d8   : > { %s3956_s16 = smov %s3958_s9  ;;  %19 = sbr.rel (!%p17_p6) target bundleno = 7 (0x7), region = 95 }
 0x1dd   :  { %2372 = vsyncpa [#allocation4], 1 }
 0x1de   :  { %2374 = vsyncpa [#allocation4 + $0x1], 1 }
 0x1df   :  { %2375 = vsyncpa [#allocation7], 1 }
 0x1e0   :  { %2376 = vsyncpa [#allocation5], 1 }
 0x1e1   :  { %2378 = vsyncpa [#allocation5 + $0x1], 1 }

</bundles_post_ra>
